<compile_context>
chip_gen: v6e
topology: v6e:2x2x1
jax: 0.10.0
libtpu: 0.0.40
codegen_flags: <defaults>
</compile_context>

<pallas_src>
import jax
import jax.numpy as jnp
from jax import lax
from jax.experimental import pallas as pl
from jax.experimental.pallas import tpu as pltpu

BN_EPS = 1e-5


# ----------------------------- wrapper helpers -----------------------------

def _zero_index_map(ndim):
    def index_map(i):
        return (0,) * ndim
    return index_map


def _pack_boundary_masks(block_b, L):
    """(block_b*L, 6) f32; columns (2k, 2k+1) hold (not_first, not_last) row masks
    for conv layer k, valid in the first block_b*(L >> k) rows."""
    rows_full = block_b * L
    cols = []
    for k in range(3):
        S = L >> k
        rows = block_b * S
        r = jnp.arange(rows)
        nf = (r % S != 0).astype(jnp.float32)
        nl = (r % S != S - 1).astype(jnp.float32)
        cols.append(jnp.pad(nf, (0, rows_full - rows)))
        cols.append(jnp.pad(nl, (0, rows_full - rows)))
    return jnp.stack(cols, axis=1)


# ----------------------------- pallas wrapper -----------------------------

def cnn1d_embed_pallas(x_ncl, kern_params, *, block_b=8,
                       operand_dtype=jnp.bfloat16):
    """x_ncl: (B, C_in, L) PyTorch NCL layout.  Returns (B, feature_dim) f32.

    block_b samples are processed per grid step as one flattened (block_b*L, C)
    tile.  Keep the grid length >= 2 (block_b <= B/2) so v7x's two TensorCores
    both get work; raise block_b for large B on v5e/v6e to amortize step cost.
    """
    w1, t1, w2, t2, w3, t3, wf, tf = kern_params
    x_ncl = x_ncl.astype(jnp.float32)
    B, Cin, L = x_ncl.shape
    assert L % 8 == 0, "three MaxPool1d(2) stages require L % 8 == 0"
    F = wf.shape[1]
    H1, H2, H3 = w1.shape[2], w2.shape[2], w3.shape[2]
    s_len = L // 8                      # rows per sample left for the avg pool

    # Pad batch up to a multiple of the batch tile (padded samples sliced off).
    Bp = pl.cdiv(B, block_b) * block_b
    if Bp != B:
        x_ncl = jnp.concatenate(
            [x_ncl, jnp.zeros((Bp - B, Cin, L), jnp.float32)], axis=0)

    # NCL -> flattened (B*L, Cin): channels on the lane dim, sample-major rows.
    x_flat = jnp.transpose(x_ncl, (0, 2, 1)).reshape(Bp * L, Cin)

    masks = _pack_boundary_masks(block_b, L)
    consts = (masks,
              w1.astype(operand_dtype), t1,
              w2.astype(operand_dtype), t2,
              w3.astype(operand_dtype), t3,
              wf.astype(operand_dtype), tf)

    def kernel(x_ref, m_ref, w1_ref, t1_ref, w2_ref, t2_ref, w3_ref, t3_ref,
               wf_ref, tf_ref, out_ref, s1_ref, s2_ref, s3_ref, s4_ref):

        def conv_bn_relu_pool(x, layer, w_ref, t_ref, scratch):
            """Conv1d(k=3,pad=1)+folded BN+ReLU+MaxPool1d(2) on a flattened
            (rows, Cin) sample-major f32 tile -> (rows//2, Cout) f32."""
            rows = x.shape[0]
            nf = m_ref[0:rows, 2 * layer:2 * layer + 1]        # 0 at seq starts
            nl = m_ref[0:rows, 2 * layer + 1:2 * layer + 2]    # 0 at seq ends
            up = (pltpu.roll(x, 1, axis=0) * nf).astype(operand_dtype)        # x[l-1]
            dn = (pltpu.roll(x, rows - 1, axis=0) * nl).astype(operand_dtype)  # x[l+1]
            xc = x.astype(operand_dtype)
            # Three accumulated tap matmuls (no lane-dim im2col concat).
            y = (jnp.dot(up, w_ref[0], preferred_element_type=jnp.float32)
                 + jnp.dot(xc, w_ref[1], preferred_element_type=jnp.float32)
                 + jnp.dot(dn, w_ref[2], preferred_element_type=jnp.float32)
                 + t_ref[...])
            y = jnp.maximum(y, 0.0)                        # ReLU (Dropout = id)
            # MaxPool1d(2): pairwise max with next row, keep even rows via a
            # strided sublane read (linear cost; no selection matmul).
            scratch[...] = jnp.maximum(y, pltpu.roll(y, rows - 1, axis=0))
            return scratch[pl.ds(0, rows // 2, stride=2), :]

        h = conv_bn_relu_pool(x_ref[...], 0, w1_ref, t1_ref, s1_ref)
        h = conv_bn_relu_pool(h, 1, w2_ref, t2_ref, s2_ref)
        h = conv_bn_relu_pool(h, 2, w3_ref, t3_ref, s3_ref)

        # AdaptiveAvgPool1d(1): roll-accumulated sum over the s_len rows of each
        # sample + one strided read -> (block_b, 4H).  No averaging matmul.
        rows = h.shape[0]
        acc = h
        for j in range(1, s_len):
            acc = acc + pltpu.roll(h, rows - j, axis=0)
        s4_ref[...] = acc
        feat = s4_ref[pl.ds(0, block_b, stride=s_len), :] * (1.0 / s_len)

        # Linear + folded BatchNorm (inference) + ReLU.
        z = jnp.dot(feat.astype(operand_dtype), wf_ref[...],
                    preferred_element_type=jnp.float32) + tf_ref[...]
        z = jnp.maximum(z, 0.0)
        # F.normalize(p=2, dim=1): rsqrt (EUP) instead of sqrt + divide;
        # identical to z / max(||z||, 1e-12).
        ss = jnp.sum(z * z, axis=1, keepdims=True)
        z = z * lax.rsqrt(jnp.maximum(ss, 1e-24))
        # Lane-dense store: pack the block's rows into one (1, 1, block_b*F) slab.
        for i in range(block_b):
            out_ref[:, :, i * F:(i + 1) * F] = (
                z[i:i + 1, :].reshape(1, 1, F).astype(out_ref.dtype))

    in_specs = [pl.BlockSpec((block_b * L, Cin), lambda i: (i, 0))]
    in_specs += [pl.BlockSpec(a.shape, _zero_index_map(a.ndim)) for a in consts]

    out = pl.pallas_call(
        kernel,
        grid=(Bp // block_b,),
        in_specs=in_specs,
        out_specs=pl.BlockSpec((1, 1, block_b * F), lambda i: (i, 0, 0)),
        out_shape=jax.ShapeDtypeStruct((Bp // block_b, 1, block_b * F),
                                       jnp.float32),
        scratch_shapes=[
            pltpu.VMEM((block_b * L, H1), jnp.float32),
            pltpu.VMEM((block_b * L // 2, H2), jnp.float32),
            pltpu.VMEM((block_b * L // 4, H3), jnp.float32),
            pltpu.VMEM((block_b * s_len, H3), jnp.float32),
        ],
        compiler_params=pltpu.CompilerParams(
            dimension_semantics=("parallel",)),
    )(x_flat, *consts)
    return out.reshape(Bp, F)[:B]


# ---------------- parameter init (deterministic, PyTorch-shaped) ----------------

def init_params(key, in_channels, hidden_dim, feature_dim):
    h1, h2, h3 = hidden_dim, hidden_dim * 2, hidden_dim * 4
    keys = jax.random.split(key, 4)

    def conv_init(k, cout, cin, ksz):
        bound = 1.0 / float(cin * ksz) ** 0.5
        kw, kb = jax.random.split(k)
        w = jax.random.uniform(kw, (cout, cin, ksz), jnp.float32, -bound, bound)
        b = jax.random.uniform(kb, (cout,), jnp.float32, -bound, bound)
        return w, b

    def linear_init(k, fout, fin):
        bound = 1.0 / float(fin) ** 0.5
        kw, kb = jax.random.split(k)
        w = jax.random.uniform(kw, (fout, fin), jnp.float32, -bound, bound)
        b = jax.random.uniform(kb, (fout,), jnp.float32, -bound, bound)
        return w, b

    def bn(c):
        gamma = jnp.ones((c,), jnp.float32)
        beta = jnp.zeros((c,), jnp.float32)
        mean = jnp.zeros((c,), jnp.float32)
        var = jnp.ones((c,), jnp.float32)
        scale = gamma / jnp.sqrt(var + BN_EPS)
        shift = beta - mean * scale
        return scale, shift

    w1, b1 = conv_init(keys[0], h1, in_channels, 3)
    w2, b2 = conv_init(keys[1], h2, h1, 3)
    w3, b3 = conv_init(keys[2], h3, h2, 3)
    wf, bf = linear_init(keys[3], feature_dim, h3)
    s1, t1 = bn(h1)
    s2, t2 = bn(h2)
    s3, t3 = bn(h3)
    sf, tf = bn(feature_dim)
    return dict(w1=w1, b1=b1, s1=s1, t1=t1, w2=w2, b2=b2, s2=s2, t2=t2,
                w3=w3, b3=b3, s3=s3, t3=t3, wf=wf, bf=bf, sf=sf, tf=tf)


def to_kernel_params(p):
    """PyTorch layouts -> folded kernel layouts (kept f32; the wrapper casts the
    matmul operands to `operand_dtype`).

    conv weight (Cout, Cin, 3) -> (3, Cin, Cout) tap-major with the BatchNorm
    scale folded in; conv bias + BN -> one (1, Cout) shift.
    linear (F, 4H) -> (4H, F) with BN scale folded; bias + BN -> (1, F) shift.
    """
    def conv(w, b, scale, shift):
        wk = jnp.transpose(w, (2, 1, 0)) * scale[None, None, :]   # (3, Cin, Cout)
        tk = (b * scale + shift)[None, :]
        return wk, tk

    def linear(w, b, scale, shift):
        wk = w.T * scale[None, :]
        tk = (b * scale + shift)[None, :]
        return wk, tk

    w1, t1 = conv(p['w1'], p['b1'], p['s1'], p['t1'])
    w2, t2 = conv(p['w2'], p['b2'], p['s2'], p['t2'])
    w3, t3 = conv(p['w3'], p['b3'], p['s3'], p['t3'])
    wf, tf = linear(p['wf'], p['bf'], p['sf'], p['tf'])
    return (w1, t1, w2, t2, w3, t3, wf, tf)


# ---------------- plain-JAX reference (mirrors the PyTorch module) ----------------

def cnn1d_embed_reference(x_ncl, p):
    def block(x, w, b, scale, shift):
        y = jax.lax.conv_general_dilated(
            x, w, window_strides=(1,), padding=((1, 1),),
            dimension_numbers=('NCH', 'OIH', 'NCH'))
        y = y + b[None, :, None]
        y = y * scale[None, :, None] + shift[None, :, None]
        y = jnp.maximum(y, 0.0)
        y = jax.lax.reduce_window(y, -jnp.inf, jax.lax.max,
                                  (1, 1, 2), (1, 1, 2), 'VALID')
        return y

    x = x_ncl.astype(jnp.float32)
    x = block(x, p['w1'], p['b1'], p['s1'], p['t1'])
    x = block(x, p['w2'], p['b2'], p['s2'], p['t2'])
    x = block(x, p['w3'], p['b3'], p['s3'], p['t3'])
    x = jnp.mean(x, axis=2)                                   # AdaptiveAvgPool1d(1)
    z = x @ p['wf'].T + p['bf']
    z = z * p['sf'] + p['tf']
    z = jnp.maximum(z, 0.0)
    norm = jnp.sqrt(jnp.sum(z * z, axis=1, keepdims=True))
    return z / jnp.maximum(norm, 1e-12)


if __name__ == "__main__":
    key = jax.random.PRNGKey(0)
    kx, kp = jax.random.split(key)

    B, C_IN, L = 16, 4, 16           # input (B, in_channels, seq_len), NCL like PyTorch
    HIDDEN, FEATURE = 8, 16          # hidden_dim, feature_dim
    BLOCK_B = 8                      # grid=(2,): both v7x TensorCores get a step;
                                     # raise for larger B on v5e/v6e.

    x = jax.random.normal(kx, (B, C_IN, L), jnp.float32)
    params = init_params(kp, C_IN, HIDDEN, FEATURE)
    kern_params = to_kernel_params(params)
    ref = jax.block_until_ready(cnn1d_embed_reference(x, params))

    # Exact-semantics check: f32 matmul operands match the reference tightly.
    out_f32 = jax.block_until_ready(
        cnn1d_embed_pallas(x, kern_params, block_b=BLOCK_B,
                           operand_dtype=jnp.float32))
    assert out_f32.shape == (B, FEATURE), out_f32.shape
    assert jnp.allclose(out_f32, ref, atol=1e-4, rtol=1e-4)

    # Default perf path: bf16 matmul operands, f32 accumulation / element-wise.
    out_bf16 = jax.block_until_ready(
        cnn1d_embed_pallas(x, kern_params, block_b=BLOCK_B))
    assert out_bf16.shape == (B, FEATURE), out_bf16.shape
    assert jnp.allclose(out_bf16, ref, atol=5e-2, rtol=5e-2)

    print("KERNEL_OK")
</pallas_src>

<mosaic_0001>
module attributes {stable_mosaic.version = 11 : i64} {
  func.func @kernel(%arg0: i32, %arg1: memref<128x4xf32, #tpu.memory_space<vmem>>, %arg2: memref<128x6xf32, #tpu.memory_space<vmem>>, %arg3: memref<3x4x8xf32, #tpu.memory_space<vmem>>, %arg4: memref<1x8xf32, #tpu.memory_space<vmem>>, %arg5: memref<3x8x16xf32, #tpu.memory_space<vmem>>, %arg6: memref<1x16xf32, #tpu.memory_space<vmem>>, %arg7: memref<3x16x32xf32, #tpu.memory_space<vmem>>, %arg8: memref<1x32xf32, #tpu.memory_space<vmem>>, %arg9: memref<32x16xf32, #tpu.memory_space<vmem>>, %arg10: memref<1x16xf32, #tpu.memory_space<vmem>>, %arg11: memref<1x1x128xf32, #tpu.memory_space<vmem>>, %arg12: memref<128x8xf32, #tpu.memory_space<vmem>>, %arg13: memref<64x16xf32, #tpu.memory_space<vmem>>, %arg14: memref<32x32xf32, #tpu.memory_space<vmem>>, %arg15: memref<16x32xf32, #tpu.memory_space<vmem>>) attributes {dimension_semantics = [#tpu.dimension_semantics<parallel>], iteration_bounds = array<i64: 2>, scalar_prefetch = 0 : i64, scratch_operands = 4 : i64, tpu.core_type = #tpu.core_type<tc>, window_params = [{transform_indices = @transform_0, window_bounds = array<i64: 128, 4>}, {pipeline_mode = #tpu.pipeline_mode<synchronous>, transform_indices = @transform_1, window_bounds = array<i64: 128, 6>}, {pipeline_mode = #tpu.pipeline_mode<synchronous>, transform_indices = @transform_2, window_bounds = array<i64: 3, 4, 8>}, {pipeline_mode = #tpu.pipeline_mode<synchronous>, transform_indices = @transform_3, window_bounds = array<i64: 1, 8>}, {pipeline_mode = #tpu.pipeline_mode<synchronous>, transform_indices = @transform_4, window_bounds = array<i64: 3, 8, 16>}, {pipeline_mode = #tpu.pipeline_mode<synchronous>, transform_indices = @transform_5, window_bounds = array<i64: 1, 16>}, {pipeline_mode = #tpu.pipeline_mode<synchronous>, transform_indices = @transform_6, window_bounds = array<i64: 3, 16, 32>}, {pipeline_mode = #tpu.pipeline_mode<synchronous>, transform_indices = @transform_7, window_bounds = array<i64: 1, 32>}, {pipeline_mode = #tpu.pipeline_mode<synchronous>, transform_indices = @transform_8, window_bounds = array<i64: 32, 16>}, {pipeline_mode = #tpu.pipeline_mode<synchronous>, transform_indices = @transform_9, window_bounds = array<i64: 1, 16>}, {transform_indices = @transform_10, window_bounds = array<i64: 1, 1, 128>}]} {
    %c0 = arith.constant 0 : index
    %c0_0 = arith.constant 0 : index
    %0 = vector.load %arg1[%c0, %c0_0] : memref<128x4xf32, #tpu.memory_space<vmem>>, vector<128x4xf32>
    %c0_1 = arith.constant 0 : index
    %c0_2 = arith.constant 0 : index
    %1 = vector.load %arg2[%c0_1, %c0_2] : memref<128x6xf32, #tpu.memory_space<vmem>>, vector<128x1xf32>
    %c0_3 = arith.constant 0 : index
    %c1 = arith.constant 1 : index
    %2 = vector.load %arg2[%c0_3, %c1] : memref<128x6xf32, #tpu.memory_space<vmem>>, vector<128x1xf32>
    %c1_i32 = arith.constant 1 : i32
    %3 = tpu.dynamic_rotate %0 by %c1_i32 dim 0 : vector<128x4xf32>, i32 -> vector<128x4xf32>
    %4 = vector.broadcast %1 : vector<128x1xf32> to vector<128x4xf32>
    %5 = arith.mulf %3, %4 : vector<128x4xf32>
    %c127_i32 = arith.constant 127 : i32
    %6 = tpu.dynamic_rotate %0 by %c127_i32 dim 0 : vector<128x4xf32>, i32 -> vector<128x4xf32>
    %7 = vector.broadcast %2 : vector<128x1xf32> to vector<128x4xf32>
    %8 = arith.mulf %6, %7 : vector<128x4xf32>
    %c0_4 = arith.constant 0 : index
    %c0_5 = arith.constant 0 : index
    %c0_6 = arith.constant 0 : index
    %9 = vector.load %arg3[%c0_4, %c0_5, %c0_6] : memref<3x4x8xf32, #tpu.memory_space<vmem>>, vector<1x4x8xf32>
    %10 = vector.shape_cast %9 : vector<1x4x8xf32> to vector<4x8xf32>
    %cst = arith.constant dense<0.000000e+00> : vector<128x8xf32>
    %11 = tpu.matmul %5, %10, %cst {dimension_numbers = #tpu.dot_dimension_numbers<[1], [0], [0], [1], [0, 0, 1, 1], [], []>} : vector<128x4xf32>, vector<4x8xf32>, vector<128x8xf32> -> vector<128x8xf32>
    %c1_7 = arith.constant 1 : index
    %c0_8 = arith.constant 0 : index
    %c0_9 = arith.constant 0 : index
    %12 = vector.load %arg3[%c1_7, %c0_8, %c0_9] : memref<3x4x8xf32, #tpu.memory_space<vmem>>, vector<1x4x8xf32>
    %13 = vector.shape_cast %12 : vector<1x4x8xf32> to vector<4x8xf32>
    %cst_10 = arith.constant dense<0.000000e+00> : vector<128x8xf32>
    %14 = tpu.matmul %0, %13, %cst_10 {dimension_numbers = #tpu.dot_dimension_numbers<[1], [0], [0], [1], [0, 0, 1, 1], [], []>} : vector<128x4xf32>, vector<4x8xf32>, vector<128x8xf32> -> vector<128x8xf32>
    %15 = arith.addf %11, %14 : vector<128x8xf32>
    %c2 = arith.constant 2 : index
    %c0_11 = arith.constant 0 : index
    %c0_12 = arith.constant 0 : index
    %16 = vector.load %arg3[%c2, %c0_11, %c0_12] : memref<3x4x8xf32, #tpu.memory_space<vmem>>, vector<1x4x8xf32>
    %17 = vector.shape_cast %16 : vector<1x4x8xf32> to vector<4x8xf32>
    %cst_13 = arith.constant dense<0.000000e+00> : vector<128x8xf32>
    %18 = tpu.matmul %8, %17, %cst_13 {dimension_numbers = #tpu.dot_dimension_numbers<[1], [0], [0], [1], [0, 0, 1, 1], [], []>} : vector<128x4xf32>, vector<4x8xf32>, vector<128x8xf32> -> vector<128x8xf32>
    %19 = arith.addf %15, %18 : vector<128x8xf32>
    %c0_14 = arith.constant 0 : index
    %c0_15 = arith.constant 0 : index
    %20 = vector.load %arg4[%c0_14, %c0_15] : memref<1x8xf32, #tpu.memory_space<vmem>>, vector<1x8xf32>
    %21 = vector.broadcast %20 : vector<1x8xf32> to vector<128x8xf32>
    %22 = arith.addf %19, %21 : vector<128x8xf32>
    %cst_16 = arith.constant 0.000000e+00 : f32
    %23 = vector.broadcast %cst_16 : f32 to vector<128x8xf32>
    %24 = arith.maximumf %22, %23 : vector<128x8xf32>
    %c127_i32_17 = arith.constant 127 : i32
    %25 = tpu.dynamic_rotate %24 by %c127_i32_17 dim 0 : vector<128x8xf32>, i32 -> vector<128x8xf32>
    %26 = arith.maximumf %24, %25 : vector<128x8xf32>
    %c0_18 = arith.constant 0 : index
    %c0_19 = arith.constant 0 : index
    %27 = vector.load %arg12[%c0_18, %c0_19] : memref<128x8xf32, #tpu.memory_space<vmem>>, vector<128x8xf32>
    tpu.vector_store %arg12[%c0_18, %c0_19], %26 {strides = array<i32>} : memref<128x8xf32, #tpu.memory_space<vmem>>, vector<128x8xf32>,
    %c0_20 = arith.constant 0 : index
    %c0_21 = arith.constant 0 : index
    %28 = tpu.strided_load %arg12[%c0_20, %c0_21] {strides = array<i32: 2, 1>} : memref<128x8xf32, #tpu.memory_space<vmem>>, vector<64x8xf32>
    %c0_22 = arith.constant 0 : index
    %c2_23 = arith.constant 2 : index
    %29 = vector.load %arg2[%c0_22, %c2_23] : memref<128x6xf32, #tpu.memory_space<vmem>>, vector<64x1xf32>
    %c0_24 = arith.constant 0 : index
    %c3 = arith.constant 3 : index
    %30 = vector.load %arg2[%c0_24, %c3] : memref<128x6xf32, #tpu.memory_space<vmem>>, vector<64x1xf32>
    %c1_i32_25 = arith.constant 1 : i32
    %31 = tpu.dynamic_rotate %28 by %c1_i32_25 dim 0 : vector<64x8xf32>, i32 -> vector<64x8xf32>
    %32 = vector.broadcast %29 : vector<64x1xf32> to vector<64x8xf32>
    %33 = arith.mulf %31, %32 : vector<64x8xf32>
    %c63_i32 = arith.constant 63 : i32
    %34 = tpu.dynamic_rotate %28 by %c63_i32 dim 0 : vector<64x8xf32>, i32 -> vector<64x8xf32>
    %35 = vector.broadcast %30 : vector<64x1xf32> to vector<64x8xf32>
    %36 = arith.mulf %34, %35 : vector<64x8xf32>
    %c0_26 = arith.constant 0 : index
    %c0_27 = arith.constant 0 : index
    %c0_28 = arith.constant 0 : index
    %37 = vector.load %arg5[%c0_26, %c0_27, %c0_28] : memref<3x8x16xf32, #tpu.memory_space<vmem>>, vector<1x8x16xf32>
    %38 = vector.shape_cast %37 : vector<1x8x16xf32> to vector<8x16xf32>
    %cst_29 = arith.constant dense<0.000000e+00> : vector<64x16xf32>
    %39 = tpu.matmul %33, %38, %cst_29 {dimension_numbers = #tpu.dot_dimension_numbers<[1], [0], [0], [1], [0, 0, 1, 1], [], []>} : vector<64x8xf32>, vector<8x16xf32>, vector<64x16xf32> -> vector<64x16xf32>
    %c1_30 = arith.constant 1 : index
    %c0_31 = arith.constant 0 : index
    %c0_32 = arith.constant 0 : index
    %40 = vector.load %arg5[%c1_30, %c0_31, %c0_32] : memref<3x8x16xf32, #tpu.memory_space<vmem>>, vector<1x8x16xf32>
    %41 = vector.shape_cast %40 : vector<1x8x16xf32> to vector<8x16xf32>
    %cst_33 = arith.constant dense<0.000000e+00> : vector<64x16xf32>
    %42 = tpu.matmul %28, %41, %cst_33 {dimension_numbers = #tpu.dot_dimension_numbers<[1], [0], [0], [1], [0, 0, 1, 1], [], []>} : vector<64x8xf32>, vector<8x16xf32>, vector<64x16xf32> -> vector<64x16xf32>
    %43 = arith.addf %39, %42 : vector<64x16xf32>
    %c2_34 = arith.constant 2 : index
    %c0_35 = arith.constant 0 : index
    %c0_36 = arith.constant 0 : index
    %44 = vector.load %arg5[%c2_34, %c0_35, %c0_36] : memref<3x8x16xf32, #tpu.memory_space<vmem>>, vector<1x8x16xf32>
    %45 = vector.shape_cast %44 : vector<1x8x16xf32> to vector<8x16xf32>
    %cst_37 = arith.constant dense<0.000000e+00> : vector<64x16xf32>
    %46 = tpu.matmul %36, %45, %cst_37 {dimension_numbers = #tpu.dot_dimension_numbers<[1], [0], [0], [1], [0, 0, 1, 1], [], []>} : vector<64x8xf32>, vector<8x16xf32>, vector<64x16xf32> -> vector<64x16xf32>
    %47 = arith.addf %43, %46 : vector<64x16xf32>
    %c0_38 = arith.constant 0 : index
    %c0_39 = arith.constant 0 : index
    %48 = vector.load %arg6[%c0_38, %c0_39] : memref<1x16xf32, #tpu.memory_space<vmem>>, vector<1x16xf32>
    %49 = vector.broadcast %48 : vector<1x16xf32> to vector<64x16xf32>
    %50 = arith.addf %47, %49 : vector<64x16xf32>
    %cst_40 = arith.constant 0.000000e+00 : f32
    %51 = vector.broadcast %cst_40 : f32 to vector<64x16xf32>
    %52 = arith.maximumf %50, %51 : vector<64x16xf32>
    %c63_i32_41 = arith.constant 63 : i32
    %53 = tpu.dynamic_rotate %52 by %c63_i32_41 dim 0 : vector<64x16xf32>, i32 -> vector<64x16xf32>
    %54 = arith.maximumf %52, %53 : vector<64x16xf32>
    %c0_42 = arith.constant 0 : index
    %c0_43 = arith.constant 0 : index
    %55 = vector.load %arg13[%c0_42, %c0_43] : memref<64x16xf32, #tpu.memory_space<vmem>>, vector<64x16xf32>
    tpu.vector_store %arg13[%c0_42, %c0_43], %54 {strides = array<i32>} : memref<64x16xf32, #tpu.memory_space<vmem>>, vector<64x16xf32>,
    %c0_44 = arith.constant 0 : index
    %c0_45 = arith.constant 0 : index
    %56 = tpu.strided_load %arg13[%c0_44, %c0_45] {strides = array<i32: 2, 1>} : memref<64x16xf32, #tpu.memory_space<vmem>>, vector<32x16xf32>
    %c0_46 = arith.constant 0 : index
    %c4 = arith.constant 4 : index
    %57 = vector.load %arg2[%c0_46, %c4] : memref<128x6xf32, #tpu.memory_space<vmem>>, vector<32x1xf32>
    %c0_47 = arith.constant 0 : index
    %c5 = arith.constant 5 : index
    %58 = vector.load %arg2[%c0_47, %c5] : memref<128x6xf32, #tpu.memory_space<vmem>>, vector<32x1xf32>
    %c1_i32_48 = arith.constant 1 : i32
    %59 = tpu.dynamic_rotate %56 by %c1_i32_48 dim 0 : vector<32x16xf32>, i32 -> vector<32x16xf32>
    %60 = vector.broadcast %57 : vector<32x1xf32> to vector<32x16xf32>
    %61 = arith.mulf %59, %60 : vector<32x16xf32>
    %c31_i32 = arith.constant 31 : i32
    %62 = tpu.dynamic_rotate %56 by %c31_i32 dim 0 : vector<32x16xf32>, i32 -> vector<32x16xf32>
    %63 = vector.broadcast %58 : vector<32x1xf32> to vector<32x16xf32>
    %64 = arith.mulf %62, %63 : vector<32x16xf32>
    %c0_49 = arith.constant 0 : index
    %c0_50 = arith.constant 0 : index
    %c0_51 = arith.constant 0 : index
    %65 = vector.load %arg7[%c0_49, %c0_50, %c0_51] : memref<3x16x32xf32, #tpu.memory_space<vmem>>, vector<1x16x32xf32>
    %66 = vector.shape_cast %65 : vector<1x16x32xf32> to vector<16x32xf32>
    %cst_52 = arith.constant dense<0.000000e+00> : vector<32x32xf32>
    %67 = tpu.matmul %61, %66, %cst_52 {dimension_numbers = #tpu.dot_dimension_numbers<[1], [0], [0], [1], [0, 0, 1, 1], [], []>} : vector<32x16xf32>, vector<16x32xf32>, vector<32x32xf32> -> vector<32x32xf32>
    %c1_53 = arith.constant 1 : index
    %c0_54 = arith.constant 0 : index
    %c0_55 = arith.constant 0 : index
    %68 = vector.load %arg7[%c1_53, %c0_54, %c0_55] : memref<3x16x32xf32, #tpu.memory_space<vmem>>, vector<1x16x32xf32>
    %69 = vector.shape_cast %68 : vector<1x16x32xf32> to vector<16x32xf32>
    %cst_56 = arith.constant dense<0.000000e+00> : vector<32x32xf32>
    %70 = tpu.matmul %56, %69, %cst_56 {dimension_numbers = #tpu.dot_dimension_numbers<[1], [0], [0], [1], [0, 0, 1, 1], [], []>} : vector<32x16xf32>, vector<16x32xf32>, vector<32x32xf32> -> vector<32x32xf32>
    %71 = arith.addf %67, %70 : vector<32x32xf32>
    %c2_57 = arith.constant 2 : index
    %c0_58 = arith.constant 0 : index
    %c0_59 = arith.constant 0 : index
    %72 = vector.load %arg7[%c2_57, %c0_58, %c0_59] : memref<3x16x32xf32, #tpu.memory_space<vmem>>, vector<1x16x32xf32>
    %73 = vector.shape_cast %72 : vector<1x16x32xf32> to vector<16x32xf32>
    %cst_60 = arith.constant dense<0.000000e+00> : vector<32x32xf32>
    %74 = tpu.matmul %64, %73, %cst_60 {dimension_numbers = #tpu.dot_dimension_numbers<[1], [0], [0], [1], [0, 0, 1, 1], [], []>} : vector<32x16xf32>, vector<16x32xf32>, vector<32x32xf32> -> vector<32x32xf32>
    %75 = arith.addf %71, %74 : vector<32x32xf32>
    %c0_61 = arith.constant 0 : index
    %c0_62 = arith.constant 0 : index
    %76 = vector.load %arg8[%c0_61, %c0_62] : memref<1x32xf32, #tpu.memory_space<vmem>>, vector<1x32xf32>
    %77 = vector.broadcast %76 : vector<1x32xf32> to vector<32x32xf32>
    %78 = arith.addf %75, %77 : vector<32x32xf32>
    %cst_63 = arith.constant 0.000000e+00 : f32
    %79 = vector.broadcast %cst_63 : f32 to vector<32x32xf32>
    %80 = arith.maximumf %78, %79 : vector<32x32xf32>
    %c31_i32_64 = arith.constant 31 : i32
    %81 = tpu.dynamic_rotate %80 by %c31_i32_64 dim 0 : vector<32x32xf32>, i32 -> vector<32x32xf32>
    %82 = arith.maximumf %80, %81 : vector<32x32xf32>
    %c0_65 = arith.constant 0 : index
    %c0_66 = arith.constant 0 : index
    %83 = vector.load %arg14[%c0_65, %c0_66] : memref<32x32xf32, #tpu.memory_space<vmem>>, vector<32x32xf32>
    tpu.vector_store %arg14[%c0_65, %c0_66], %82 {strides = array<i32>} : memref<32x32xf32, #tpu.memory_space<vmem>>, vector<32x32xf32>,
    %c0_67 = arith.constant 0 : index
    %c0_68 = arith.constant 0 : index
    %84 = tpu.strided_load %arg14[%c0_67, %c0_68] {strides = array<i32: 2, 1>} : memref<32x32xf32, #tpu.memory_space<vmem>>, vector<16x32xf32>
    %c15_i32 = arith.constant 15 : i32
    %85 = tpu.dynamic_rotate %84 by %c15_i32 dim 0 : vector<16x32xf32>, i32 -> vector<16x32xf32>
    %86 = arith.addf %84, %85 : vector<16x32xf32>
    %c0_69 = arith.constant 0 : index
    %c0_70 = arith.constant 0 : index
    %87 = vector.load %arg15[%c0_69, %c0_70] : memref<16x32xf32, #tpu.memory_space<vmem>>, vector<16x32xf32>
    tpu.vector_store %arg15[%c0_69, %c0_70], %86 {strides = array<i32>} : memref<16x32xf32, #tpu.memory_space<vmem>>, vector<16x32xf32>,
    %c0_71 = arith.constant 0 : index
    %c0_72 = arith.constant 0 : index
    %88 = tpu.strided_load %arg15[%c0_71, %c0_72] {strides = array<i32: 2, 1>} : memref<16x32xf32, #tpu.memory_space<vmem>>, vector<8x32xf32>
    %cst_73 = arith.constant 5.000000e-01 : f32
    %89 = vector.broadcast %cst_73 : f32 to vector<8x32xf32>
    %90 = arith.mulf %88, %89 : vector<8x32xf32>
    %c0_74 = arith.constant 0 : index
    %c0_75 = arith.constant 0 : index
    %91 = vector.load %arg9[%c0_74, %c0_75] : memref<32x16xf32, #tpu.memory_space<vmem>>, vector<32x16xf32>
    %cst_76 = arith.constant dense<0.000000e+00> : vector<8x16xf32>
    %92 = tpu.matmul %90, %91, %cst_76 {dimension_numbers = #tpu.dot_dimension_numbers<[1], [0], [0], [1], [0, 0, 1, 1], [], []>} : vector<8x32xf32>, vector<32x16xf32>, vector<8x16xf32> -> vector<8x16xf32>
    %c0_77 = arith.constant 0 : index
    %c0_78 = arith.constant 0 : index
    %93 = vector.load %arg10[%c0_77, %c0_78] : memref<1x16xf32, #tpu.memory_space<vmem>>, vector<1x16xf32>
    %94 = vector.broadcast %93 : vector<1x16xf32> to vector<8x16xf32>
    %95 = arith.addf %92, %94 : vector<8x16xf32>
    %cst_79 = arith.constant 0.000000e+00 : f32
    %96 = vector.broadcast %cst_79 : f32 to vector<8x16xf32>
    %97 = arith.maximumf %95, %96 : vector<8x16xf32>
    %98 = arith.mulf %97, %97 : vector<8x16xf32>
    %cst_80 = arith.constant dense<0.000000e+00> : vector<8xf32>
    %99 = vector.multi_reduction <add>, %98, %cst_80 [1] : vector<8x16xf32> to vector<8xf32>
    %100 = vector.shape_cast %99 : vector<8xf32> to vector<8x1xf32>
    %cst_81 = arith.constant 1.000000e-24 : f32
    %101 = vector.broadcast %cst_81 : f32 to vector<8x1xf32>
    %102 = arith.maximumf %100, %101 : vector<8x1xf32>
    %103 = math.rsqrt %102 : vector<8x1xf32>
    %104 = vector.broadcast %103 : vector<8x1xf32> to vector<8x16xf32>
    %105 = arith.mulf %97, %104 : vector<8x16xf32>
    %106 = vector.extract_strided_slice %105 {offsets = [0, 0], sizes = [1, 16], strides = [1, 1]} : vector<8x16xf32> to vector<1x16xf32>
    %107 = vector.shape_cast %106 : vector<1x16xf32> to vector<1x1x16xf32>
    %c0_82 = arith.constant 0 : index
    %c0_83 = arith.constant 0 : index
    %c0_84 = arith.constant 0 : index
    %108 = vector.load %arg11[%c0_82, %c0_83, %c0_84] : memref<1x1x128xf32, #tpu.memory_space<vmem>>, vector<1x1x16xf32>
    tpu.vector_store %arg11[%c0_82, %c0_83, %c0_84], %107 {strides = array<i32>} : memref<1x1x128xf32, #tpu.memory_space<vmem>>, vector<1x1x16xf32>,
    %109 = vector.extract_strided_slice %105 {offsets = [1, 0], sizes = [1, 16], strides = [1, 1]} : vector<8x16xf32> to vector<1x16xf32>
    %110 = vector.shape_cast %109 : vector<1x16xf32> to vector<1x1x16xf32>
    %c0_85 = arith.constant 0 : index
    %c0_86 = arith.constant 0 : index
    %c16 = arith.constant 16 : index
    %111 = vector.load %arg11[%c0_85, %c0_86, %c16] : memref<1x1x128xf32, #tpu.memory_space<vmem>>, vector<1x1x16xf32>
    tpu.vector_store %arg11[%c0_85, %c0_86, %c16], %110 {strides = array<i32>} : memref<1x1x128xf32, #tpu.memory_space<vmem>>, vector<1x1x16xf32>,
    %112 = vector.extract_strided_slice %105 {offsets = [2, 0], sizes = [1, 16], strides = [1, 1]} : vector<8x16xf32> to vector<1x16xf32>
    %113 = vector.shape_cast %112 : vector<1x16xf32> to vector<1x1x16xf32>
    %c0_87 = arith.constant 0 : index
    %c0_88 = arith.constant 0 : index
    %c32 = arith.constant 32 : index
    %114 = vector.load %arg11[%c0_87, %c0_88, %c32] : memref<1x1x128xf32, #tpu.memory_space<vmem>>, vector<1x1x16xf32>
    tpu.vector_store %arg11[%c0_87, %c0_88, %c32], %113 {strides = array<i32>} : memref<1x1x128xf32, #tpu.memory_space<vmem>>, vector<1x1x16xf32>,
    %115 = vector.extract_strided_slice %105 {offsets = [3, 0], sizes = [1, 16], strides = [1, 1]} : vector<8x16xf32> to vector<1x16xf32>
    %116 = vector.shape_cast %115 : vector<1x16xf32> to vector<1x1x16xf32>
    %c0_89 = arith.constant 0 : index
    %c0_90 = arith.constant 0 : index
    %c48 = arith.constant 48 : index
    %117 = vector.load %arg11[%c0_89, %c0_90, %c48] : memref<1x1x128xf32, #tpu.memory_space<vmem>>, vector<1x1x16xf32>
    tpu.vector_store %arg11[%c0_89, %c0_90, %c48], %116 {strides = array<i32>} : memref<1x1x128xf32, #tpu.memory_space<vmem>>, vector<1x1x16xf32>,
    %118 = vector.extract_strided_slice %105 {offsets = [4, 0], sizes = [1, 16], strides = [1, 1]} : vector<8x16xf32> to vector<1x16xf32>
    %119 = vector.shape_cast %118 : vector<1x16xf32> to vector<1x1x16xf32>
    %c0_91 = arith.constant 0 : index
    %c0_92 = arith.constant 0 : index
    %c64 = arith.constant 64 : index
    %120 = vector.load %arg11[%c0_91, %c0_92, %c64] : memref<1x1x128xf32, #tpu.memory_space<vmem>>, vector<1x1x16xf32>
    tpu.vector_store %arg11[%c0_91, %c0_92, %c64], %119 {strides = array<i32>} : memref<1x1x128xf32, #tpu.memory_space<vmem>>, vector<1x1x16xf32>,
    %121 = vector.extract_strided_slice %105 {offsets = [5, 0], sizes = [1, 16], strides = [1, 1]} : vector<8x16xf32> to vector<1x16xf32>
    %122 = vector.shape_cast %121 : vector<1x16xf32> to vector<1x1x16xf32>
    %c0_93 = arith.constant 0 : index
    %c0_94 = arith.constant 0 : index
    %c80 = arith.constant 80 : index
    %123 = vector.load %arg11[%c0_93, %c0_94, %c80] : memref<1x1x128xf32, #tpu.memory_space<vmem>>, vector<1x1x16xf32>
    tpu.vector_store %arg11[%c0_93, %c0_94, %c80], %122 {strides = array<i32>} : memref<1x1x128xf32, #tpu.memory_space<vmem>>, vector<1x1x16xf32>,
    %124 = vector.extract_strided_slice %105 {offsets = [6, 0], sizes = [1, 16], strides = [1, 1]} : vector<8x16xf32> to vector<1x16xf32>
    %125 = vector.shape_cast %124 : vector<1x16xf32> to vector<1x1x16xf32>
    %c0_95 = arith.constant 0 : index
    %c0_96 = arith.constant 0 : index
    %c96 = arith.constant 96 : index
    %126 = vector.load %arg11[%c0_95, %c0_96, %c96] : memref<1x1x128xf32, #tpu.memory_space<vmem>>, vector<1x1x16xf32>
    tpu.vector_store %arg11[%c0_95, %c0_96, %c96], %125 {strides = array<i32>} : memref<1x1x128xf32, #tpu.memory_space<vmem>>, vector<1x1x16xf32>,
    %127 = vector.extract_strided_slice %105 {offsets = [7, 0], sizes = [1, 16], strides = [1, 1]} : vector<8x16xf32> to vector<1x16xf32>
    %128 = vector.shape_cast %127 : vector<1x16xf32> to vector<1x1x16xf32>
    %c0_97 = arith.constant 0 : index
    %c0_98 = arith.constant 0 : index
    %c112 = arith.constant 112 : index
    %129 = vector.load %arg11[%c0_97, %c0_98, %c112] : memref<1x1x128xf32, #tpu.memory_space<vmem>>, vector<1x1x16xf32>
    tpu.vector_store %arg11[%c0_97, %c0_98, %c112], %128 {strides = array<i32>} : memref<1x1x128xf32, #tpu.memory_space<vmem>>, vector<1x1x16xf32>,
    return
  }
  func.func @transform_0(%arg0: i32) -> (i32, i32) {
    %c0_i32 = arith.constant 0 : i32
    %c0_i32_0 = arith.constant 0 : i32
    return %arg0, %c0_i32 : i32, i32
  }
  func.func @transform_1(%arg0: i32) -> (i32, i32) {
    %c0_i32 = arith.constant 0 : i32
    %c0_i32_0 = arith.constant 0 : i32
    %c0_i32_1 = arith.constant 0 : i32
    return %c0_i32, %c0_i32_0 : i32, i32
  }
  func.func @transform_2(%arg0: i32) -> (i32, i32, i32) {
    %c0_i32 = arith.constant 0 : i32
    %c0_i32_0 = arith.constant 0 : i32
    %c0_i32_1 = arith.constant 0 : i32
    %c0_i32_2 = arith.constant 0 : i32
    return %c0_i32, %c0_i32_0, %c0_i32_1 : i32, i32, i32
  }
  func.func @transform_3(%arg0: i32) -> (i32, i32) {
    %c0_i32 = arith.constant 0 : i32
    %c0_i32_0 = arith.constant 0 : i32
    %c0_i32_1 = arith.constant 0 : i32
    return %c0_i32, %c0_i32_0 : i32, i32
  }
  func.func @transform_4(%arg0: i32) -> (i32, i32, i32) {
    %c0_i32 = arith.constant 0 : i32
    %c0_i32_0 = arith.constant 0 : i32
    %c0_i32_1 = arith.constant 0 : i32
    %c0_i32_2 = arith.constant 0 : i32
    return %c0_i32, %c0_i32_0, %c0_i32_1 : i32, i32, i32
  }
  func.func @transform_5(%arg0: i32) -> (i32, i32) {
    %c0_i32 = arith.constant 0 : i32
    %c0_i32_0 = arith.constant 0 : i32
    %c0_i32_1 = arith.constant 0 : i32
    return %c0_i32, %c0_i32_0 : i32, i32
  }
  func.func @transform_6(%arg0: i32) -> (i32, i32, i32) {
    %c0_i32 = arith.constant 0 : i32
    %c0_i32_0 = arith.constant 0 : i32
    %c0_i32_1 = arith.constant 0 : i32
    %c0_i32_2 = arith.constant 0 : i32
    return %c0_i32, %c0_i32_0, %c0_i32_1 : i32, i32, i32
  }
  func.func @transform_7(%arg0: i32) -> (i32, i32) {
    %c0_i32 = arith.constant 0 : i32
    %c0_i32_0 = arith.constant 0 : i32
    %c0_i32_1 = arith.constant 0 : i32
    return %c0_i32, %c0_i32_0 : i32, i32
  }
  func.func @transform_8(%arg0: i32) -> (i32, i32) {
    %c0_i32 = arith.constant 0 : i32
    %c0_i32_0 = arith.constant 0 : i32
    %c0_i32_1 = arith.constant 0 : i32
    return %c0_i32, %c0_i32_0 : i32, i32
  }
  func.func @transform_9(%arg0: i32) -> (i32, i32) {
    %c0_i32 = arith.constant 0 : i32
    %c0_i32_0 = arith.constant 0 : i32
    %c0_i32_1 = arith.constant 0 : i32
    return %c0_i32, %c0_i32_0 : i32, i32
  }
  func.func @transform_10(%arg0: i32) -> (i32, i32, i32) {
    %c0_i32 = arith.constant 0 : i32
    %c0_i32_0 = arith.constant 0 : i32
    %c0_i32_1 = arith.constant 0 : i32
    return %arg0, %c0_i32, %c0_i32_0 : i32, i32, i32
  }
}

</mosaic_0001>

<bundles_post_ra>
// kernel: tpu_custom_call.1
= control target key start
LH: loop header
LB: loop body
LE: loop exit
PB: predicated region body
PF: predicated region fallthrough
CT: control target
= control target key end

     0   :  { %15 = vsyncpa [#allocation7], 0  ;;  %s4026_s0 = inlined_call_operand.vmem [shape: f32[256,4], index: 0, kind: input, shape index: {}]   ;;  %s4027_s1 = inlined_call_operand.vmem [shape: f32[128,6], index: 1, kind: input, shape index: {}]   ;;  %s4028_s2 = inlined_call_operand.vmem [shape: f32[3,4,8], index: 2, kind: input, shape index: {}]   ;;  %s4029_s3 = inlined_call_operand.vmem [shape: f32[1,8], index: 3, kind: input, shape index: {}]   ;;  %s4030_s4 = inlined_call_operand.vmem [shape: f32[3,8,16], index: 4, kind: input, shape index: {}]   ;;  %s4031_s5 = inlined_call_operand.vmem [shape: f32[1,16], index: 5, kind: input, shape index: {}]   ;;  %s4032_s6 = inlined_call_operand.vmem [shape: f32[3,16,32], index: 6, kind: input, shape index: {}]   ;;  %s4033_s7 = inlined_call_operand.vmem [shape: f32[1,32], index: 7, kind: input, shape index: {}]   ;;  %s4034_s8 = inlined_call_operand.vmem [shape: f32[32,16], index: 8, kind: input, shape index: {}]   ;;  %s4035_s9 = inlined_call_operand.vmem [shape: f32[1,16], index: 9, kind: input, shape index: {}]   ;;  %s4036_s10 = inlined_call_operand.hbm [shape: f32[2,1,128], index: 10, kind: output, shape index: {}]  }
   0x1   :  { %17 = vsyncpa [#allocation7 + $0x1], 0  ;;  %s3161_s13 = smov 0   ;;  %s3163_s14 = smov 0  }
   0x2   :  { %s3165_s15 = smov 0   ;;  %s3167_s16 = smov 0  }
   0x3 LB: > { %s2565_s17 = sadd.s32 4294967295, %s3088_s16   ;;  %s2566_s18 = sadd.s32 4294967294, %s3088_s16   ;;  %s3088_s16 = sphi %s3167_s16, %s4042_s16   ;;  %s3084_s15 = sphi %s3165_s15, %s4041_s15   ;;  %s3080_s14 = sphi %s3163_s14, %s4040_s14   ;;  %s3076_s13 = sphi %s3161_s13, %s4039_s13  }
   0x4   : > { %s3184_s19 = sadd.s32 1, %s3088_s16   ;;  %s245_s20 = sadd.s32 1, %s3084_s15 }
   0x5   : > { %s242_s21 = ssub.s32 %s3088_s16, %s3184_s19  ;;  %p255_p0 = scmp.ne.s32.totalorder %s3084_s15, %s3080_s14 }
   0x6   : > { %p243_p1 = scmp.eq.s32.totalorder %s242_s21, 0  ;;  %p256_p2 = scmp.eq.s32.totalorder %s2565_s17, 1 }
   0x7   : > { %p261_p3 = scmp.ne.s32.totalorder %s3080_s14, %s3076_s13  ;;  %p262_p4 = scmp.eq.s32.totalorder %s2566_s18, 1 }
   0x8   : > { %s3194_s22 = scalar_select %p243_p1, %s3084_s15, %s245_s20  }
   0x9   : > { %p3196_p5 = por %p256_p2, %p255_p0  ;;  %p3200_p6 = por %p262_p4, %p261_p3 }
   0xa   : > { %p2569_p7 = scmp.ge.s32.totalorder %s3088_s16, 1  ;;  %p316_p8 = scmp.lt.s32.totalorder %s3088_s16, 3 }
   0xc   : > { %p317_p9 = pnand %p2569_p7, %p316_p8 }
   0xd   : > { %s3218_s29 = sshll.u32 (!%p317_p9), %s2565_s17, 4  ;;  %s351_s21 = sand.u32 (!%p317_p9), 1, %s3080_s14  }
   0xe   : > { %320 = sbr.rel (%p317_p9) target bundleno = 1430 (0x596), region = 60  ;;  %p354_p10 = scmp.lt.s32.totalorder (!%p317_p9), %s3218_s29, 31 }
   0xf   : > { %s3100_s26 = smov (!%p317_p9), 48   ;;  %s3101_s27 = smov (!%p317_p9), 64  }
  0x10   : > { %s3102_s28 = smov (!%p317_p9), 80   ;;  %s3103_s30 = smov (!%p317_p9), 96  }
  0x11   : > { %s3104_s11 = smov (!%p317_p9), 112  }
  0x13   : > { %v3209_v0 = vld [vmem:[%s4027_s1 + $0x10] sm:$0xff]  ;;  %v3214_v1 = vld [vmem:[%s4027_s1] sm:$0xff]  ;;  %v3090_v2 = vmov 1   ;;  %v3231_v4 = vld [vmem:[%s4027_s1 + $0x8] sm:$0xff]  ;;  %vm687_vm0 = vcmask 1043456   ;;  %s355_s17 = scalar_select %p354_p10, %s3218_s29, 31  ;;  %v407_v5 = vlaneseq }
  0x14   : > { %2993 = vset.pattern.permute.xlu0 %v3090_v2  ;;  %2991 = vset.pattern.permute.xlu1 %v3090_v2  ;;  %v3226_v3 = vld [vmem:[%s4027_s1 + $0x30] sm:$0xff]  ;;  %v2572_v6 = vld [vmem:[%s4028_s2 + $0x4] sm:$0xf]  ;;  %vm638_vm1 = vcmask 31744   ;;  %v2607_v7 = vld [vmem:[%s4028_s2 + $0x8] sm:$0xf] }
  0x15   : > { %564 = vperm.xlu0 %2993, %v3209_v0   ;;  %556 = vperm.xlu1 %2991, %v3214_v1   ;;  %s2571_s25 = sshll.u32 %s355_s17, 3  ;;  %v3245_v8 = vld [vmem:[%s4027_s1 + $0x50] sm:$0xff]  ;;  %v3256_v9 = vld [vmem:[%s4027_s1 + $0x18] sm:$0xff]  ;;  %v3265_v12 = vshrl.u32 %v407_v5, 7  ;;  %v3091_v14 = vmov 0   ;;  %v3332_v43 = vld [vmem:[%s4027_s1 + $0x20] sm:$0xff] }
  0x16   : > { %2776 = vmatprep.subr.msk.mxu0 %vm687_vm0, %v2572_v6  ;;  %s3251_s18 = scalar_lea.vmem %s4026_s0, %s2571_s25  ;;  %v635_v38 = vld [vmem:[%s4028_s2] sm:$0xf]  ;;  %v3387_v54 = vld [vmem:[%s4027_s1 + $0x28] sm:$0xff]  ;;  %vm1333_vm4 = vcmask 64512   ;;  %vm1940_vm5 = vcmask 130048   ;;  %vm3097_vm6 = vmmov 0  }
  0x17   : > { %2777 = vmatpush3.msk.msra.mxu0 %vm687_vm0, %v2572_v6  ;;  %v3260_v10 = vld [vmem:[%s3251_s18] sm:$0xff]  ;;  %v3263_v11 = vld [vmem:[%s3251_s18 + $0x8] sm:$0xff]  ;;  %v361_v13 = vld [vmem:[%s3251_s18 + $0x10] sm:$0xff]  ;;  %vm538_vm2 = vcmp.lt.s32.totalorder %v3265_v12, 7  ;;  %vm409_vm3 = vcmp.lt.s32.totalorder %v3265_v12, 1  ;;  %2802 = vmatprep.subr.msk.mxu1 %vm687_vm0, %v635_v38  ;;  %vm2350_vm7 = vcmask 261120  }
  0x18   : > { %2778 = vmatprep.mubr.msk.f32.mxu0 %vm638_vm1, %v3260_v10  ;;  %2828 = vmatprep.subr.msk.mxu0 %vm687_vm0, %v2607_v7  ;;  %v362_v15 = vld [vmem:[%s3251_s18 + $0x18] sm:$0xff]  ;;  %v391_v16 = vrot.slane %v3260_v10, 7  ;;  %v392_v17 = vrot.slane %v3263_v11, 7  ;;  %v393_v20 = vrot.slane %v361_v13, 7  ;;  %v524_v21 = vrot.slane %v361_v13, 1  ;;  %v363_v22 = vld [vmem:[%s3251_s18 + $0x20] sm:$0xff] }
  0x19   : > { %580 = vperm.xlu0 %2993, %v3226_v3   ;;  %560 = vperm.xlu1 %2991, %v3231_v4   ;;  %v525_v18 = vrot.slane %v362_v15, 1  ;;  %v3281_v19 = vld [vmem:[%s3251_s18 + $0x38] sm:$0xff]  ;;  %v3288_v24 = vld [vmem:[%s3251_s18 + $0x50] sm:$0xff]  ;;  %v394_v26 = vrot.slane %v362_v15, 7  ;;  %v526_v27 = vrot.slane %v363_v22, 1  ;;  %v523_v31 = vrot.slane %v3263_v11, 1 }
  0x1a   : > { %2779 = vmatmul.mubr.msk.f32.vlgmr.msra.gmra.mxu0 %vm638_vm1, %v3263_v11  ;;  %v529_v23 = vrot.slane %v3281_v19, 1  ;;  %v3291_v25 = vld [vmem:[%s3251_s18 + $0x58] sm:$0xff]  ;;  %v365_v28 = vld [vmem:[%s3251_s18 + $0x30] sm:$0xff]  ;;  %v532_v29 = vrot.slane %v3288_v24, 1  ;;  %v395_v32 = vrot.slane %v363_v22, 7  ;;  %v364_v33 = vld [vmem:[%s3251_s18 + $0x28] sm:$0xff]  ;;  %v3352_v47 = vsel %vm409_vm3, %v391_v16, %v392_v17  ;;  %2803 = vmatpush3.msk.msra.mxu1 %vm687_vm0, %v635_v38 }
  0x1b   : > { %2781 = vmatprep.mubr.msk.f32.mxu0 %vm638_vm1, %v361_v13  ;;  %2829 = vmatpush3.msk.msra.mxu0 %vm687_vm0, %v2607_v7  ;;  %v533_v30 = vrot.slane %v3291_v25, 1  ;;  %v528_v34 = vrot.slane %v365_v28, 1  ;;  %v396_v35 = vrot.slane %v364_v33, 7  ;;  %v3306_v36 = vsel %vm538_vm2, %v524_v21, %v525_v18  ;;  %v3309_v37 = vld [vmem:[%s3251_s18 + $0x78] sm:$0xff]  ;;  %v367_v52 = vld [vmem:[%s3251_s18 + $0x40] sm:$0xff]  ;;  %v368_v56 = vld [vmem:[%s3251_s18 + $0x48] sm:$0xff] }
  0x1c   : > { %v527_v39 = vrot.slane %v364_v33, 1  ;;  %v406_v40 = vrot.slane %v3309_v37, 7  ;;  %v3320_v41 = vsel %vm538_vm2, %v523_v31, %v524_v21  ;;  %v3344_v45 = vsel %vm409_vm3, %v393_v20, %v394_v26  ;;  %v371_v62 = vld [vmem:[%s3251_s18 + $0x60] sm:$0xff]  ;;  %v3422_v7 = vld [vmem:[%s4027_s1 + $0x38] sm:$0xff]  ;;  %v384_v13 = vld [vmem:[%s4027_s1 + $0x48] sm:$0xff]  ;;  %s3974_s17 = scalar_lea.vmem [#allocation6], %s351_s21 }
  0x1d   : > { %596 = vperm.xlu0 %2993, %v3245_v8   ;;  %2992 = vset.pattern.permute.xlu1 %v3091_v14  ;;  %v3326_v42 = vsel %vm538_vm2, %v528_v34, %v529_v23  ;;  %v3340_v44 = vsel %vm538_vm2, %v532_v29, %v533_v30  ;;  %v3348_v46 = vsel %vm538_vm2, %v525_v18, %v526_v27  ;;  %v397_v55 = vrot.slane %v365_v28, 7  ;;  %s3099_s25 = smov 32   ;;  %s2511_s12 = sshll.u32 %s3974_s17, 4  ;;  %s2512_s12 = int_to_ptr.vmem [resolvable:$true] %s2511_s12 }
  0x1e   : > { %443 = vperm.xlu1 %2992, %v3256_v9   ;;  %2782 = vmatmul.mubr.msk.f32.gmra.mxu0 %vm638_vm1, %v362_v15  ;;  %v3360_v48 = vsel %vm409_vm3, %v406_v40, %v391_v16  ;;  %v3364_v49 = vsel %vm409_vm3, %v394_v26, %v395_v32  ;;  %v3368_v50 = vsel %vm409_vm3, %v392_v17, %v393_v20  ;;  %v398_v58 = vrot.slane %v3281_v19, 7  ;;  %v372_v16 = vld [vmem:[%s3251_s18 + $0x68] sm:$0xff]  ;;  %v373_v17 = vld [vmem:[%s3251_s18 + $0x70] sm:$0xff]  ;;  %s3098_s18 = smov 16  }
  0x1f   : > { %2784 = vmatprep.mubr.msk.f32.mxu0 %vm638_vm1, %v363_v22  ;;  %v3376_v51 = vsel %vm538_vm2, %v526_v27, %v527_v39  ;;  %v3381_v53 = vsel %vm409_vm3, %v395_v32, %v396_v35  ;;  %v3396_v57 = vsel %vm538_vm2, %v527_v39, %v528_v34  ;;  %v399_v59 = vrot.slane %v367_v52, 7  ;;  %v389_v32 = vld [vmem:[%s4027_s1 + $0x70] sm:$0xff] }
  0x20   : > { %v400_v60 = vrot.slane %v368_v56, 7  ;;  %v3404_v61 = vsel %vm409_vm3, %v396_v35, %v397_v55  ;;  %v3412_v63 = vsel %vm409_vm3, %v397_v55, %v398_v58  ;;  %v530_v5 = vrot.slane %v367_v52, 1 }
  0x21   : > { %3002 = vset.pattern.permute.xlu0 %v3091_v14  ;;  %v401_v15 = vrot.slane %v3288_v24, 7  ;;  %v403_v21 = vrot.slane %v371_v62, 7  ;;  %v404_v22 = vrot.slane %v372_v16, 7  ;;  %v3457_v26 = vsel %vm409_vm3, %v398_v58, %v399_v59  ;;  %v387_v58 = vld [vmem:[%s4027_s1 + $0x60] sm:$0xff] }
  0x22   : > { %428 = vperm.xlu0 %3002, %v3214_v1   ;;  %2994 = vset.pattern.permute.xlu1 %v3090_v2  ;;  %v3417_v6 = vsel %vm409_vm3, %v399_v59, %v400_v60  ;;  %v3439_v18 = vsel %vm538_vm2, %v529_v23, %v530_v5  ;;  %v405_v23 = vrot.slane %v373_v17, 7  ;;  %v531_v27 = vrot.slane %v368_v56, 1 }
  0x23   : > { %568 = vperm.xlu1 %2994, %v3256_v9   ;;  %2785 = vmatmul.mubr.msk.f32.gmra.mxu0 %vm638_vm1, %v364_v33  ;;  %v3444_v20 = vsel %vm409_vm3, %v400_v60, %v401_v15  ;;  %v402_v38 = vrot.slane %v3291_v25, 7  ;;  %v537_v60 = vrot.slane %v3309_v37, 1  ;;  %vm2460_vm8 = vcmask 122880  }
  0x24   : > { %2787 = vmatprep.mubr.msk.f32.mxu0 %vm638_vm1, %v365_v28  ;;  %v3461_v28 = vsel %vm409_vm3, %v403_v21, %v404_v22  ;;  %v3472_v33 = vsel %vm409_vm3, %v404_v22, %v405_v23  ;;  %v3476_v34 = vsel %vm538_vm2, %v530_v5, %v531_v27  ;;  %v3483_v35 = vsel %vm538_vm2, %v531_v27, %v532_v29  ;;  %v390_v5 = vld [vmem:[%s4027_s1 + $0x78] sm:$0xff] }
  0x25   : > { %v3489_v39 = vsel %vm409_vm3, %v401_v15, %v402_v38  ;;  %v3504_v55 = vsel %vm409_vm3, %v402_v38, %v403_v21  ;;  %v3092_v15 = vmov 3   ;;  %vm2466_vm9 = vcmask 255105  }
  0x26   : > { %433 = vperm.xlu0 %3002, %v3231_v4   ;;  %vm2471_vm10 = vcmask 387330   ;;  %vm2476_vm11 = vcmask 519555   ;;  %vm2481_vm12 = vcmask 651780   ;;  %vm2486_vm13 = vcmask 784005  }
  0x27   : > { %2995 = vset.pattern.permute.xlu1 %v3091_v14  ;;  %2788 = vmatmul.mubr.msk.f32.gmra.mxu0 %vm638_vm1, %v3281_v19  ;;  %v388_v19 = vld [vmem:[%s4027_s1 + $0x68] sm:$0xff]  ;;  %vm2491_vm14 = vcmask 916230   ;;  %vm2496_vm15 = vcmask 1048455  }
  0x28   : > { %448 = vperm.xlu1 %2995, %v3332_v43   ;;  %2790 = vmatprep.mubr.msk.f32.mxu0 %vm638_vm1, %v367_v52  ;;  %v534_v52 = vrot.slane %v371_v62, 1 }
  0x2a   : > { %438 = vperm.xlu0 %3002, %v3209_v0   ;;  %v3499_v29 = vsel %vm538_vm2, %v533_v30, %v534_v52 }
  0x2b   : > { %2791 = vmatmul.mubr.msk.f32.gmra.mxu0 %vm638_vm1, %v368_v56  ;;  %v535_v56 = vrot.slane %v372_v16, 1 }
  0x2c   : > { %2996 = vset.pattern.permute.xlu1 %v3090_v2  ;;  %2793 = vmatprep.mubr.msk.f32.mxu0 %vm638_vm1, %v3288_v24  ;;  %v386_v24 = vld [vmem:[%s4027_s1 + $0x58] sm:$0xff] }
  0x2d   : > { %572 = vperm.xlu1 %2996, %v3332_v43   ;;  %v3512_v30 = vsel %vm538_vm2, %v534_v52, %v535_v56 }
  0x2e   : > { %453 = vperm.xlu0 %3002, %v3387_v54  }
  0x2f   : > { %2794 = vmatmul.mubr.msk.f32.gmra.mxu0 %vm638_vm1, %v3291_v25  ;;  %v536_v25 = vrot.slane %v373_v17, 1 }
  0x30   : > { %2796 = vmatprep.mubr.msk.f32.mxu0 %vm638_vm1, %v371_v62  ;;  %v3524_v62 = vsel %vm409_vm3, %v405_v23, %v406_v40  ;;  %v3093_v40 = vmov 2  }
  0x31   : > { %576 = vperm.xlu1 %2996, %v3387_v54   ;;  %v3517_v59 = vsel %vm538_vm2, %v535_v56, %v536_v25 }
  0x32   : > { %458 = vperm.xlu0 %3002, %v3226_v3  }
  0x33   : > { %2797 = vmatmul.mubr.msk.f32.gmra.mxu0 %vm638_vm1, %v372_v16 }
  0x34   : > { %2799 = vmatprep.mubr.msk.f32.mxu0 %vm638_vm1, %v373_v17 }
  0x35   : > { %2997 = vset.pattern.permute.xlu1 %v3091_v14 }
  0x36   : > { %463 = vperm.xlu1 %2997, %v3422_v7   ;;  %473 = vperm.xlu0 %3002, %v384_v13  }
  0x37   : > { %2800 = vmatmul.mubr.msk.f32.gmra.mxu0 %vm638_vm1, %v3309_v37 }
  0x3a   : > { %2998 = vset.pattern.permute.xlu1 %v3090_v2  ;;  %478 = vperm.xlu0 %3002, %v3245_v8   ;;  %v383_v8 = vld [vmem:[%s4027_s1 + $0x40] sm:$0xff] }
  0x3b   : > { %584 = vperm.xlu1 %2998, %v3422_v7  }
  0x3e   : > { %493 = vperm.xlu0 %3002, %v388_v19  }
  0x3f   : > { %2999 = vset.pattern.permute.xlu1 %v3091_v14 }
  0x40   : > { %468 = vperm.xlu1 %2999, %v383_v8  }
  0x42   : > { %498 = vperm.xlu0 %3002, %v389_v32  }
  0x44   : > { %3000 = vset.pattern.permute.xlu1 %v3090_v2 }
  0x45   : > { %588 = vperm.xlu1 %3000, %v383_v8  }
  0x46   : > { %3007 = vset.pattern.permute.xlu0 %v3090_v2 }
  0x47   : > { %612 = vperm.xlu0 %3007, %v389_v32  }
  0x49   : > { %592 = vperm.xlu1 %3000, %v384_v13   ;;  %v3533_v13 = vsel %vm538_vm2, %v536_v25, %v537_v60 }
  0x4b   : > { %3012 = vset.pattern.permute.xlu0 %v3092_v15 }
  0x4c   : > { %1462 = vperm.xlu0 %3012, %v3209_v0  }
  0x4d   : > { %3001 = vset.pattern.permute.xlu1 %v3091_v14 }
  0x4e   : > { %483 = vperm.xlu1 %3001, %v386_v24  }
  0x50   : > { %3013 = vset.pattern.permute.xlu0 %v3093_v40 }
  0x51   : > { %1396 = vperm.xlu0 %3013, %v3231_v4  }
  0x52   : > { %3003 = vset.pattern.permute.xlu1 %v3090_v2 }
  0x53   : > { %600 = vperm.xlu1 %3003, %v386_v24  }
  0x55   : > { %1401 = vperm.xlu0 %3013, %v3209_v0   ;;  %v522_v0 = vrot.slane %v3260_v10, 1 }
  0x57   : > { %3004 = vset.pattern.permute.xlu1 %v3091_v14 }
  0x58   : > { %488 = vperm.xlu1 %3004, %v387_v58  }
  0x59   : > { %1416 = vperm.xlu0 %3013, %v3387_v54  }
  0x5c   : > { %3005 = vset.pattern.permute.xlu1 %v3090_v2 }
  0x5d   : > { %604 = vperm.xlu1 %3005, %v387_v58   ;;  %1421 = vperm.xlu0 %3013, %v3226_v3  }
  0x61   : > { %608 = vperm.xlu1 %3005, %v388_v19   ;;  %3018 = vset.pattern.permute.xlu0 %v3092_v15 }
  0x62   : > { %1478 = vperm.xlu0 %3018, %v3226_v3  }
  0x65   : > { %3006 = vset.pattern.permute.xlu1 %v3091_v14 }
  0x66   : > { %503 = vperm.xlu1 %3006, %v390_v5  }
  0x6a   : > { %3008 = vset.pattern.permute.xlu1 %v3090_v2 }
  0x6b   : > { %616 = vperm.xlu1 %3008, %v390_v5  }
  0x6f   : > { %3009 = vset.pattern.permute.xlu1 %v3093_v40 }
  0x70   : > { %1391 = vperm.xlu1 %3009, %v3214_v1  }
  0x74   : > { %3010 = vset.pattern.permute.xlu1 %v3092_v15 }
  0x75   : > { %1454 = vperm.xlu1 %3010, %v3214_v1   ;;  %v553_v1 = vsel %vm538_vm2, %v522_v0, %v523_v31 }
  0x79   : > { %1458 = vperm.xlu1 %3010, %v3231_v4  }
  0x7d   : > { %3011 = vset.pattern.permute.xlu1 %v3093_v40 }
  0x7e   : > { %1406 = vperm.xlu1 %3011, %v3256_v9  }
  0x82   : > { %3014 = vset.pattern.permute.xlu1 %v3092_v15 }
  0x83   : > { %1466 = vperm.xlu1 %3014, %v3256_v9  }
  0x87   : > { %3015 = vset.pattern.permute.xlu1 %v3093_v40 }
  0x88   : > { %1411 = vperm.xlu1 %3015, %v3332_v43  }
  0x8c   : > { %3016 = vset.pattern.permute.xlu1 %v3092_v15 }
  0x8d   : > { %1470 = vperm.xlu1 %3016, %v3332_v43  }
  0x90   : > { %v557_v2 = vpop.permute.xlu1 %556  ;;  %v565_v3 = vpop.permute.xlu0 %564 }
  0x91   : > { %v619_v4 = vmul.f32 %v557_v2, %v553_v1  ;;  %1474 = vperm.xlu1 %3016, %v3387_v54   ;;  %v621_v9 = vmul.f32 %v565_v3, %v3306_v36 }
  0x93   : > { %2830 = vmatprep.mubr.msk.f32.mxu0 %vm638_vm1, %v619_v4 }
  0x94   : > { %v561_v14 = vpop.permute.xlu1 %560  ;;  %v581_v16 = vpop.permute.xlu0 %580 }
  0x95   : > { %v620_v43 = vmul.f32 %v561_v14, %v3320_v41  ;;  %3017 = vset.pattern.permute.xlu1 %v3093_v40 }
  0x96   : > { %1426 = vperm.xlu1 %3017, %v3422_v7  }
  0x97   : > { %2831 = vmatmul.mubr.msk.f32.vlgmr.msra.gmra.mxu0 %vm638_vm1, %v620_v43 }
  0x98   : > { %v597_v11 = vpop.permute.xlu0 %596  ;;  %2833 = vmatprep.mubr.msk.f32.mxu0 %vm638_vm1, %v621_v9 }
  0x99   : > { %v444_v31 = vpop.permute.xlu1 %443  ;;  %v629_v40 = vmul.f32 %v597_v11, %v3340_v44 }
  0x9a   : > { %3019 = vset.pattern.permute.xlu1 %v3092_v15 }
  0x9b   : > { %1482 = vperm.xlu1 %3019, %v3422_v7   ;;  %v509_v7 = vmul.f32 %v444_v31, %v3344_v45 }
  0x9d   : > { %v429_v54 = vpop.permute.xlu0 %428 }
  0x9e   : > { %v506_v17 = vmul.f32 %v429_v54, %v3360_v48  ;;  %v569_v36 = vpop.permute.xlu1 %568 }
  0x9f   : > { %v622_v21 = vmul.f32 %v569_v36, %v3348_v46 }
  0xa0   : > { %2804 = vmatprep.mubr.msk.f32.mxu1 %vm638_vm1, %v506_v17  ;;  %v3639_v17 = vld [vmem:[%s4030_s4] sm:$0xff] }
  0xa1   : > { %v434_v41 = vpop.permute.xlu0 %433  ;;  %2834 = vmatmul.mubr.msk.f32.gmra.mxu0 %vm638_vm1, %v622_v21 }
  0xa2   : > { %v507_v22 = vmul.f32 %v434_v41, %v3352_v47 }
  0xa3   : > { %v449_v19 = vpop.permute.xlu1 %448 }
  0xa4   : > { %2805 = vmatmul.mubr.msk.f32.vlgmr.msra.gmra.mxu1 %vm638_vm1, %v507_v22  ;;  %v510_v48 = vmul.f32 %v449_v19, %v3364_v49 }
  0xa5   : > { %v439_v23 = vpop.permute.xlu0 %438 }
  0xa6   : > { %v508_v27 = vmul.f32 %v439_v23, %v3368_v50  ;;  %v625_v50 = vmul.f32 %v581_v16, %v3326_v42 }
  0xa8   : > { %v573_v8 = vpop.permute.xlu1 %572  ;;  %2807 = vmatprep.mubr.msk.f32.mxu1 %vm638_vm1, %v508_v27 }
  0xa9   : > { %v623_v46 = vmul.f32 %v573_v8, %v3376_v51  ;;  %2808 = vmatmul.mubr.msk.f32.gmra.mxu1 %vm638_vm1, %v509_v7  ;;  %v454_v32 = vpop.permute.xlu0 %453  ;;  %v1956_v7 = vld [vmem:[%s4027_s1] sm:$0xff]  ;;  %v3094_v8 = vmov 4  }
  0xaa   : > { %v511_v47 = vmul.f32 %v454_v32, %v3381_v53  ;;  %2810 = vmatprep.mubr.msk.f32.mxu1 %vm638_vm1, %v510_v48  ;;  %v1957_v48 = vld [vmem:[%s4027_s1 + $0x8] sm:$0xff]  ;;  %3020 = vset.pattern.permute.xlu1 %v3094_v8 }
  0xab   : > { %2836 = vmatprep.mubr.msk.f32.mxu0 %vm638_vm1, %v623_v46  ;;  %3021 = vset.pattern.permute.xlu0 %v3094_v8  ;;  %v1958_v46 = vld [vmem:[%s4027_s1 + $0x10] sm:$0xff] }
  0xac   : > { %v577_v38 = vpop.permute.xlu1 %576  ;;  %1970 = vperm.xlu1 %3020, %v1956_v7   ;;  %1975 = vperm.xlu0 %3021, %v1957_v48  }
  0xad   : > { %v624_v45 = vmul.f32 %v577_v38, %v3396_v57  ;;  %2811 = vmatmul.mubr.msk.f32.gmra.mxu1 %vm638_vm1, %v511_v47  ;;  %v459_v49 = vpop.permute.xlu0 %458  ;;  %v3095_v47 = vmov 5  }
  0xae   : > { %v512_v52 = vmul.f32 %v459_v49, %v3404_v61 }
  0xaf   : > { %2837 = vmatmul.mubr.msk.f32.gmra.mxu0 %vm638_vm1, %v624_v45  ;;  %v1959_v45 = vld [vmem:[%s4027_s1 + $0x18] sm:$0xff] }
  0xb0   : > { %2813 = vmatprep.mubr.msk.f32.mxu1 %vm638_vm1, %v512_v52  ;;  %2839 = vmatprep.mubr.msk.f32.mxu0 %vm638_vm1, %v625_v50 }
  0xb1   : > { %v464_v51 = vpop.permute.xlu1 %463  ;;  %v474_v42 = vpop.permute.xlu0 %473  ;;  %3022 = vset.pattern.permute.xlu1 %v3095_v47  ;;  %1980 = vperm.xlu0 %3021, %v1958_v46  }
  0xb2   : > { %v513_v53 = vmul.f32 %v464_v51, %v3412_v63  ;;  %v515_v56 = vmul.f32 %v474_v42, %v3417_v6  ;;  %2001 = vperm.xlu1 %3022, %v1956_v7  }
  0xb4   : > { %2814 = vmatmul.mubr.msk.f32.gmra.mxu1 %vm638_vm1, %v513_v53  ;;  %v3677_v53 = vld [vmem:[%s4029_s3] ss:$0 sm:$0xff] }
  0xb5   : > { %v479_v61 = vpop.permute.xlu0 %478  ;;  %3024 = vset.pattern.permute.xlu0 %v3095_v47 }
  0xb6   : > { %v585_v24 = vpop.permute.xlu1 %584  ;;  %v516_v25 = vmul.f32 %v479_v61, %v3444_v20  ;;  %2005 = vperm.xlu1 %3022, %v1957_v48   ;;  %2009 = vperm.xlu0 %3024, %v1958_v46  }
  0xb7   : > { %v626_v57 = vmul.f32 %v585_v24, %v3439_v18 }
  0xb9   : > { %2840 = vmatmul.mubr.msk.f32.gmra.mxu0 %vm638_vm1, %v626_v57  ;;  %v494_v1 = vpop.permute.xlu0 %493 }
  0xba   : > { %v519_v44 = vmul.f32 %v494_v1, %v3461_v28  ;;  %3023 = vset.pattern.permute.xlu1 %v3094_v8 }
  0xbb   : > { %v469_v58 = vpop.permute.xlu1 %468  ;;  %1985 = vperm.xlu1 %3023, %v1959_v45  }
  0xbc   : > { %v514_v5 = vmul.f32 %v469_v58, %v3457_v26 }
  0xbd   : > { %v499_v3 = vpop.permute.xlu0 %498 }
  0xbe   : > { %2816 = vmatprep.mubr.msk.f32.mxu1 %vm638_vm1, %v514_v5  ;;  %v520_v9 = vmul.f32 %v499_v3, %v3472_v33 }
  0xbf   : > { %2817 = vmatmul.mubr.msk.f32.gmra.mxu1 %vm638_vm1, %v515_v56  ;;  %3025 = vset.pattern.permute.xlu1 %v3095_v47 }
  0xc0   : > { %v589_v63 = vpop.permute.xlu1 %588  ;;  %2819 = vmatprep.mubr.msk.f32.mxu1 %vm638_vm1, %v516_v25  ;;  %2013 = vperm.xlu1 %3025, %v1959_v45  }
  0xc1   : > { %v627_v15 = vmul.f32 %v589_v63, %v3476_v34 }
  0xc3   : > { %2842 = vmatprep.mubr.msk.f32.mxu0 %vm638_vm1, %v627_v15 }
  0xc4   : > { %v593_v18 = vpop.permute.xlu1 %592 }
  0xc5   : > { %v628_v6 = vmul.f32 %v593_v18, %v3483_v35 }
  0xc7   : > { %2843 = vmatmul.mubr.msk.f32.gmra.mxu0 %vm638_vm1, %v628_v6 }
  0xc8   : > { %2845 = vmatprep.mubr.msk.f32.mxu0 %vm638_vm1, %v629_v40 }
  0xc9   : > { %v484_v20 = vpop.permute.xlu1 %483 }
  0xca   : > { %v517_v26 = vmul.f32 %v484_v20, %v3489_v39 }
  0xcc   : > { %2820 = vmatmul.mubr.msk.f32.gmra.mxu1 %vm638_vm1, %v517_v26 }
  0xce   : > { %v601_v2 = vpop.permute.xlu1 %600 }
  0xcf   : > { %v630_v34 = vmul.f32 %v601_v2, %v3499_v29  ;;  %v613_v29 = vpop.permute.xlu0 %612 }
  0xd0   : > { %v633_v43 = vmul.f32 %v613_v29, %v3533_v13 }
  0xd1   : > { %2846 = vmatmul.mubr.msk.f32.gmra.mxu0 %vm638_vm1, %v630_v34 }
  0xd3   : > { %v489_v4 = vpop.permute.xlu1 %488 }
  0xd4   : > { %v518_v35 = vmul.f32 %v489_v4, %v3504_v55 }
  0xd6   : > { %2822 = vmatprep.mubr.msk.f32.mxu1 %vm638_vm1, %v518_v35 }
  0xd7   : > { %2823 = vmatmul.mubr.msk.f32.gmra.mxu1 %vm638_vm1, %v519_v44 }
  0xd8   : > { %v605_v39 = vpop.permute.xlu1 %604  ;;  %2825 = vmatprep.mubr.msk.f32.mxu1 %vm638_vm1, %v520_v9 }
  0xd9   : > { %v631_v14 = vmul.f32 %v605_v39, %v3512_v30  ;;  %v554_v30 = vsel %vm538_vm2, %v537_v60, %v522_v0 }
  0xda   : > { %v2780_v10 = vpop.f32.mrf.mxu0 }
  0xdb   : > { %2848 = vmatprep.mubr.msk.f32.mxu0 %vm638_vm1, %v631_v14 }
  0xdc   : > { %v609_v16 = vpop.permute.xlu1 %608  ;;  %v757_v37 = vpop.f32.mrf.mxu0 }
  0xdd   : > { %v632_v55 = vmul.f32 %v609_v16, %v3517_v59  ;;  %v2626_v59 = vld [vmem:[%s4030_s4 + $0x8] sm:$0xff] }
  0xde   : > { %2854 = vmatprep.subr.mxu1 %v2626_v59  ;;  %v2783_v31 = vpop.f32.mrf.mxu0 }
  0xdf   : > { %2849 = vmatmul.mubr.msk.f32.gmra.mxu0 %vm638_vm1, %v632_v55  ;;  %2855 = vmatpush3.msra.mxu1 %v2626_v59 }
  0xe0   : > { %2851 = vmatprep.mubr.msk.f32.mxu0 %vm638_vm1, %v633_v43  ;;  %v767_v60 = vpop.f32.mrf.mxu0  ;;  %2868 = vmatprep.subr.mxu1 %v3639_v17 }
  0xe1   : > { %v504_v28 = vpop.permute.xlu1 %503 }
  0xe2   : > { %v521_v33 = vmul.f32 %v504_v28, %v3524_v62  ;;  %v2643_v62 = vld [vmem:[%s4030_s4 + $0x10] sm:$0xff] }
  0xe3   : > { %2882 = vmatprep.subr.mxu0 %v2643_v62  ;;  %v2786_v0 = vpop.f32.mrf.mxu0 }
  0xe4   : > { %2826 = vmatmul.mubr.msk.f32.gmra.mxu1 %vm638_vm1, %v521_v33  ;;  %2883 = vmatpush3.msra.mxu0 %v2643_v62 }
  0xe5   : > { %v3634_v54 = vpop.f32.mrf.mxu0 }
  0xe6   : > { %v617_v11 = vpop.permute.xlu1 %616 }
  0xe7   : > { %v634_v13 = vmul.f32 %v617_v11, %v554_v30  ;;  %v3642_v36 = vpop.f32.mrf.mxu0 }
  0xe9   : > { %2852 = vmatmul.mubr.msk.f32.gmra.mxu0 %vm638_vm1, %v634_v13  ;;  %v3644_v21 = vpop.f32.mrf.mxu0 }
  0xeb   : > { %v3646_v41 = vpop.f32.mrf.mxu0 }
  0xed   : > { %v3648_v22 = vpop.f32.mrf.mxu0 }
  0xef   : > { %v3650_v19 = vpop.f32.mrf.mxu0 }
  0xf1   : > { %v3652_v23 = vpop.f32.mrf.mxu0 }
  0xf3   : > { %v3654_v27 = vpop.f32.mrf.mxu0 }
  0xf5   : > { %v3665_v32 = vpop.f32.mrf.mxu0 }
  0xf7   : > { %v3667_v50 = vpop.f32.mrf.mxu0 }
  0xf9   : > { %v3669_v38 = vpop.f32.mrf.mxu0 }
 0x157   : > { %v2832_v49 = vpop.f32.mrf.mxu0 }
 0x159   : > { %v1151_v24 = vpop.f32.mrf.mxu0 }
 0x161   : > { %v2835_v61 = vpop.f32.mrf.mxu0 }
 0x163   : > { %v1161_v26 = vpop.f32.mrf.mxu0 }
 0x164   : > { %v2806_v52 = vpop.f32.mrf.mxu1 }
 0x165   : > { %v959_v51 = vadd.f32 %v2806_v52, %v2780_v10 }
 0x166   : > { %v953_v42 = vpop.f32.mrf.mxu1 }
 0x167   : > { %v1231_v57 = vadd.f32 %v2832_v49, %v959_v51  ;;  %v954_v56 = vadd.f32 %v953_v42, %v757_v37 }
 0x169   : > { %v1254_v58 = vadd.f32 %v3677_v53, %v1231_v57  ;;  %v1230_v25 = vadd.f32 %v1151_v24, %v954_v56  ;;  %v2809_v5 = vpop.f32.mrf.mxu1 }
 0x16a   : > { %v969_v63 = vadd.f32 %v2809_v5, %v2783_v31 }
 0x16b   : > { %v1270_v15 = vmax.f32 %v1254_v58, 0.0  ;;  %v1253_v18 = vadd.f32 %v3677_v53, %v1230_v25  ;;  %v963_v6 = vpop.f32.mrf.mxu1 }
 0x16c   : > { %v1233_v40 = vadd.f32 %v2835_v61, %v969_v63  ;;  %v964_v20 = vadd.f32 %v963_v6, %v767_v60 }
 0x16d   : > { %v1269_v1 = vmax.f32 %v1253_v18, 0.0  ;;  %v2812_v2 = vpop.f32.mrf.mxu1  ;;  %v1286_v35 = vrot.slane %v1270_v15, 1 }
 0x16e   : > { %v1256_v34 = vadd.f32 %v3677_v53, %v1233_v40  ;;  %v1232_v3 = vadd.f32 %v1161_v26, %v964_v20  ;;  %v979_v4 = vadd.f32 %v2812_v2, %v2786_v0 }
 0x16f   : > { %v3682_v44 = vrot.slane %v1269_v1, 1  ;;  %v973_v9 = vpop.f32.mrf.mxu1  ;;  %v2838_v39 = vpop.f32.mrf.mxu0 }
 0x170   : > { %v1272_v14 = vmax.f32 %v1256_v34, 0.0  ;;  %v1255_v29 = vadd.f32 %v3677_v53, %v1232_v3  ;;  %v974_v16 = vadd.f32 %v973_v9, %v3634_v54  ;;  %v1235_v43 = vadd.f32 %v2838_v39, %v979_v4 }
 0x171   : > { %v1315_v55 = vsel %vm538_vm2, %v3682_v44, %v1286_v35  ;;  %v1171_v28 = vpop.f32.mrf.mxu0 }
 0x172   : > { %v1317_v33 = vmax.f32 %v1269_v1, %v1315_v55  ;;  %v1271_v30 = vmax.f32 %v1255_v29, 0.0  ;;  %v1258_v11 = vadd.f32 %v3677_v53, %v1235_v43  ;;  %v1234_v13 = vadd.f32 %v1171_v28, %v974_v16 }
 0x173   : > { %v1288_v59 = vrot.slane %v1272_v14, 1 }
 0x174   : > { %1334 = vst.msk [vmem:[#allocation2] sm:$0xff] %vm1333_vm4, %v1317_v33  ;;  %v1287_v62 = vrot.slane %v1271_v30, 1  ;;  %v2815_v10 = vpop.f32.mrf.mxu1  ;;  %v1274_v37 = vmax.f32 %v1258_v11, 0.0  ;;  %v1257_v31 = vadd.f32 %v3677_v53, %v1234_v13 }
 0x175   : > { %v989_v46 = vadd.f32 %v2815_v10, %v3642_v36 }
 0x176   : > { %v1313_v60 = vsel %vm538_vm2, %v1287_v62, %v1288_v59  ;;  %v1314_v0 = vsel %vm538_vm2, %v1286_v35, %v1287_v62  ;;  %v1273_v48 = vmax.f32 %v1257_v31, 0.0  ;;  %v983_v8 = vpop.f32.mrf.mxu1  ;;  %v1290_v47 = vrot.slane %v1274_v37, 1 }
 0x177   : > { %v1318_v54 = vmax.f32 %v1270_v15, %v1314_v0  ;;  %v1319_v7 = vmax.f32 %v1271_v30, %v1313_v60  ;;  %v984_v52 = vadd.f32 %v983_v8, %v3644_v21  ;;  %v3710_v15 = vpop.permute.xlu1 %1391 }
 0x178   : > { %v1289_v45 = vrot.slane %v1273_v48, 1 }
 0x179   : > { %1335 = vst.msk [vmem:[#allocation2 + $0x8] sm:$0xff] %vm1333_vm4, %v1318_v54  ;;  %1336 = vst.msk [vmem:[#allocation2 + $0x10] sm:$0xff] %vm1333_vm4, %v1319_v7  ;;  %v2841_v49 = vpop.f32.mrf.mxu0 }
 0x17a   : > { %v1237_v51 = vadd.f32 %v2841_v49, %v989_v46  ;;  %v1311_v42 = vsel %vm538_vm2, %v1289_v45, %v1290_v47  ;;  %v1312_v24 = vsel %vm538_vm2, %v1288_v59, %v1289_v45 }
 0x17b   : > { %v1181_v57 = vpop.f32.mrf.mxu0  ;;  %v1320_v56 = vmax.f32 %v1272_v14, %v1312_v24  ;;  %v1321_v61 = vmax.f32 %v1273_v48, %v1311_v42  ;;  %v1455_v9 = vpop.permute.xlu1 %1454 }
 0x17c   : > { %v1260_v36 = vadd.f32 %v3677_v53, %v1237_v51  ;;  %v1236_v58 = vadd.f32 %v1181_v57, %v984_v52 }
 0x17d   : > { %1337 = vst.msk [vmem:[#allocation2 + $0x18] sm:$0xff] %vm1333_vm4, %v1320_v56  ;;  %1338 = vst.msk [vmem:[#allocation2 + $0x20] sm:$0xff] %vm1333_vm4, %v1321_v61 }
 0x17e   : > { %v1276_v25 = vmax.f32 %v1260_v36, 0.0  ;;  %v1259_v21 = vadd.f32 %v3677_v53, %v1236_v58 }
 0x17f   : > { %v2818_v18 = vpop.f32.mrf.mxu1  ;;  %v1459_v10 = vpop.permute.xlu1 %1458 }
 0x180   : > { %v1275_v5 = vmax.f32 %v1259_v21, 0.0  ;;  %v3708_v63 = vld [vmem:[#allocation2] ss:$2 sm:$0xff]  ;;  %v1292_v6 = vrot.slane %v1276_v25, 1  ;;  %v999_v4 = vadd.f32 %v2818_v18, %v3646_v41 }
 0x181   : > { %2856 = vmatprep.mubr.msk.f32.mxu1 %vm1333_vm4, %v3708_v63  ;;  %v993_v34 = vpop.f32.mrf.mxu1  ;;  %v1437_v35 = vrot.slane %v3708_v63, 1 }
 0x182   : > { %v1291_v40 = vrot.slane %v1275_v5, 1  ;;  %v994_v29 = vadd.f32 %v993_v34, %v3648_v22 }
 0x184   : > { %v1309_v20 = vsel %vm538_vm2, %v1291_v40, %v1292_v6  ;;  %v1310_v26 = vsel %vm538_vm2, %v1290_v47, %v1291_v40  ;;  %v3718_v3 = vld [vmem:[#allocation2 + $0x10] ss:$2 sm:$0xff] }
 0x185   : > { %v1322_v1 = vmax.f32 %v1274_v37, %v1310_v26  ;;  %v1323_v2 = vmax.f32 %v1275_v5, %v1309_v20  ;;  %2857 = vmatmul.mubr.msk.f32.vlgmr.msra.gmra.mxu1 %vm1333_vm4, %v3718_v3  ;;  %v1438_v39 = vrot.slane %v3718_v3, 1  ;;  %v1463_v20 = vpop.permute.xlu0 %1462 }
 0x186   : > { %2869 = vmatpush3.msra.mxu1 %v3639_v17 }
 0x187   : > { %1339 = vst.msk [vmem:[#allocation2 + $0x28] sm:$0xff] %vm1333_vm4, %v1322_v1  ;;  %1340 = vst.msk [vmem:[#allocation2 + $0x30] sm:$0xff] %vm1333_vm4, %v1323_v2  ;;  %v2844_v14 = vpop.f32.mrf.mxu0  ;;  %v1451_v41 = vsel %vm538_vm2, %v1437_v35, %v1438_v39 }
 0x188   : > { %v1239_v16 = vadd.f32 %v2844_v14, %v999_v4  ;;  %v1485_v43 = vmul.f32 %v1455_v9, %v1451_v41 }
 0x189   : > { %v1191_v55 = vpop.f32.mrf.mxu0 }
 0x18a   : > { %v1262_v28 = vadd.f32 %v3677_v53, %v1239_v16  ;;  %v1238_v33 = vadd.f32 %v1191_v55, %v994_v29  ;;  %2884 = vmatprep.mubr.msk.f32.mxu0 %vm1333_vm4, %v1485_v43 }
 0x18c   : > { %v1278_v30 = vmax.f32 %v1262_v28, 0.0  ;;  %v1261_v11 = vadd.f32 %v3677_v53, %v1238_v33  ;;  %v2821_v13 = vpop.f32.mrf.mxu1 }
 0x18d   : > { %v1009_v60 = vadd.f32 %v2821_v13, %v3650_v19 }
 0x18e   : > { %v1277_v17 = vmax.f32 %v1261_v11, 0.0  ;;  %v3736_v59 = vld [vmem:[#allocation2 + $0x20] ss:$2 sm:$0xff]  ;;  %v1003_v22 = vpop.f32.mrf.mxu1  ;;  %v1294_v37 = vrot.slane %v1278_v30, 1 }
 0x18f   : > { %v1439_v62 = vrot.slane %v3736_v59, 1  ;;  %2859 = vmatprep.mubr.msk.f32.mxu1 %vm1333_vm4, %v3736_v59  ;;  %v1004_v8 = vadd.f32 %v1003_v22, %v3652_v23 }
 0x190   : > { %v1293_v31 = vrot.slane %v1277_v17, 1 }
 0x191   : > { %v1450_v0 = vsel %vm538_vm2, %v1438_v39, %v1439_v62  ;;  %v2847_v54 = vpop.f32.mrf.mxu0 }
 0x192   : > { %v1307_v7 = vsel %vm538_vm2, %v1293_v31, %v1294_v37  ;;  %v1308_v48 = vsel %vm538_vm2, %v1292_v6, %v1293_v31  ;;  %v1486_v46 = vmul.f32 %v1459_v10, %v1450_v0  ;;  %v1241_v49 = vadd.f32 %v2847_v54, %v1009_v60 }
 0x193   : > { %v1324_v47 = vmax.f32 %v1276_v25, %v1308_v48  ;;  %v1325_v45 = vmax.f32 %v1277_v17, %v1307_v7  ;;  %v1201_v52 = vpop.f32.mrf.mxu0 }
 0x194   : > { %v1240_v51 = vadd.f32 %v1201_v52, %v1004_v8  ;;  %2885 = vmatmul.mubr.msk.f32.vlgmr.msra.gmra.mxu0 %vm1333_vm4, %v1486_v46  ;;  %v1264_v19 = vadd.f32 %v3677_v53, %v1241_v49 }
 0x195   : > { %1341 = vst.msk [vmem:[#allocation2 + $0x38] sm:$0xff] %vm1333_vm4, %v1324_v47  ;;  %1342 = vst.msk [vmem:[#allocation2 + $0x40] sm:$0xff] %vm1333_vm4, %v1325_v45 }
 0x196   : > { %v1263_v42 = vadd.f32 %v3677_v53, %v1240_v51  ;;  %v1280_v24 = vmax.f32 %v1264_v19, 0.0 }
 0x197   : > { %v2824_v56 = vpop.f32.mrf.mxu1 }
 0x198   : > { %v1279_v57 = vmax.f32 %v1263_v42, 0.0  ;;  %v1296_v23 = vrot.slane %v1280_v24, 1  ;;  %v1019_v40 = vadd.f32 %v2824_v56, %v3654_v27  ;;  %v3771_v27 = vpop.permute.xlu1 %1406 }
 0x199   : > { %v1013_v18 = vpop.f32.mrf.mxu1 }
 0x19a   : > { %v1295_v61 = vrot.slane %v1279_v57, 1  ;;  %v1014_v2 = vadd.f32 %v1013_v18, %v3665_v32 }
 0x19c   : > { %v1305_v36 = vsel %vm538_vm2, %v1295_v61, %v1296_v23  ;;  %v1306_v58 = vsel %vm538_vm2, %v1294_v37, %v1295_v61  ;;  %v3758_v25 = vld [vmem:[#allocation2 + $0x30] ss:$2 sm:$0xff]  ;;  %v1467_v28 = vpop.permute.xlu1 %1466 }
 0x19d   : > { %v1326_v21 = vmax.f32 %v1278_v30, %v1306_v58  ;;  %v1327_v5 = vmax.f32 %v1279_v57, %v1305_v36  ;;  %v1440_v6 = vrot.slane %v3758_v25, 1  ;;  %2860 = vmatmul.mubr.msk.f32.gmra.mxu1 %vm1333_vm4, %v3758_v25 }
 0x19f   : > { %1343 = vst.msk [vmem:[#allocation2 + $0x48] sm:$0xff] %vm1333_vm4, %v1326_v21  ;;  %1344 = vst.msk [vmem:[#allocation2 + $0x50] sm:$0xff] %vm1333_vm4, %v1327_v5  ;;  %v2850_v26 = vpop.f32.mrf.mxu0  ;;  %v1449_v1 = vsel %vm538_vm2, %v1439_v62, %v1440_v6 }
 0x1a0   : > { %v1243_v34 = vadd.f32 %v2850_v26, %v1019_v40  ;;  %v1487_v4 = vmul.f32 %v1463_v20, %v1449_v1  ;;  %v3790_v8 = vpop.permute.xlu1 %1411  ;;  %v1374_v40 = vrot.slane %v3718_v3, 7  ;;  %v1375_v1 = vrot.slane %v3736_v59, 7 }
 0x1a1   : > { %v1211_v9 = vpop.f32.mrf.mxu0  ;;  %v1376_v59 = vrot.slane %v3758_v25, 7 }
 0x1a2   : > { %v1266_v39 = vadd.f32 %v3677_v53, %v1243_v34  ;;  %v1242_v14 = vadd.f32 %v1211_v9, %v1014_v2  ;;  %2887 = vmatprep.mubr.msk.f32.mxu0 %vm1333_vm4, %v1487_v4 }
 0x1a4   : > { %v1282_v29 = vmax.f32 %v1266_v39, 0.0  ;;  %v1265_v41 = vadd.f32 %v3677_v53, %v1242_v14  ;;  %v2827_v16 = vpop.f32.mrf.mxu1  ;;  %v1471_v51 = vpop.permute.xlu1 %1470  ;;  %v1373_v39 = vrot.slane %v3708_v63, 7 }
 0x1a5   : > { %v1029_v13 = vadd.f32 %v2827_v16, %v3667_v50  ;;  %v1397_v50 = vpop.permute.xlu0 %1396 }
 0x1a6   : > { %v1281_v43 = vmax.f32 %v1265_v41, 0.0  ;;  %v3774_v55 = vld [vmem:[#allocation2 + $0x40] ss:$2 sm:$0xff]  ;;  %v1023_v33 = vpop.f32.mrf.mxu1  ;;  %v1298_v30 = vrot.slane %v1282_v29, 1 }
 0x1a7   : > { %v1441_v32 = vrot.slane %v3774_v55, 1  ;;  %2862 = vmatprep.mubr.msk.f32.mxu1 %vm1333_vm4, %v3774_v55  ;;  %v1024_v31 = vadd.f32 %v1023_v33, %v3669_v38 }
 0x1a8   : > { %v1297_v11 = vrot.slane %v1281_v43, 1  ;;  %v1475_v21 = vpop.permute.xlu1 %1474 }
 0x1a9   : > { %v1448_v17 = vsel %vm538_vm2, %v1440_v6, %v1441_v32  ;;  %v2853_v22 = vpop.f32.mrf.mxu0  ;;  %v1402_v49 = vpop.permute.xlu0 %1401 }
 0x1aa   : > { %v1303_v62 = vsel %vm538_vm2, %v1297_v11, %v1298_v30  ;;  %v1304_v10 = vsel %vm538_vm2, %v1296_v23, %v1297_v11  ;;  %v1488_v37 = vmul.f32 %v1467_v28, %v1448_v17  ;;  %v1245_v54 = vadd.f32 %v2853_v22, %v1029_v13 }
 0x1ab   : > { %v1328_v60 = vmax.f32 %v1280_v24, %v1304_v10  ;;  %v1329_v0 = vmax.f32 %v1281_v43, %v1303_v62  ;;  %v1221_v7 = vpop.f32.mrf.mxu0  ;;  %v1386_v43 = vsel %vm409_vm3, %v1374_v40, %v1375_v1  ;;  %v1377_v28 = vrot.slane %v3774_v55, 7 }
 0x1ac   : > { %v1244_v48 = vadd.f32 %v1221_v7, %v1024_v31  ;;  %2888 = vmatmul.mubr.msk.f32.gmra.mxu0 %vm1333_vm4, %v1488_v37  ;;  %v1268_v46 = vadd.f32 %v3677_v53, %v1245_v54  ;;  %v1427_v6 = vpop.permute.xlu1 %1426  ;;  %v1431_v13 = vmul.f32 %v1402_v49, %v1386_v43  ;;  %v1385_v55 = vsel %vm409_vm3, %v1375_v1, %v1376_v59  ;;  %v2654_v54 = vld [vmem:[%s4032_s6 + $0x18] sm:$0xff]  ;;  %v2653_v7 = vld [vmem:[%s4032_s6 + $0x10] sm:$0xff] }
 0x1ad   : > { %1345 = vst.msk [vmem:[#allocation2 + $0x58] sm:$0xff] %vm1333_vm4, %v1328_v60  ;;  %1346 = vst.msk [vmem:[#allocation2 + $0x60] sm:$0xff] %vm1333_vm4, %v1329_v0  ;;  %v1417_v58 = vpop.permute.xlu0 %1416  ;;  %v1384_v63 = vsel %vm409_vm3, %v1376_v59, %v1377_v28  ;;  %2896 = vmatprep.subr.mxu1 %v2654_v54 }
 0x1ae   : > { %v1267_v47 = vadd.f32 %v3677_v53, %v1244_v48  ;;  %v1284_v45 = vmax.f32 %v1268_v46, 0.0  ;;  %v1433_v62 = vmul.f32 %v3790_v8, %v1384_v63  ;;  %v2664_v48 = vld [vmem:[%s4032_s6 + $0x28] sm:$0xff]  ;;  %v2663_v8 = vld [vmem:[%s4032_s6 + $0x20] sm:$0xff] }
 0x1af   : > { %2916 = vmatprep.subr.mxu0 %v2664_v48 }
 0x1b0   : > { %v1283_v38 = vmax.f32 %v1267_v47, 0.0  ;;  %v1300_v52 = vrot.slane %v1284_v45, 1  ;;  %2917 = vmatpush3.msra.mxu0 %v2664_v48 }
 0x1b1   : > { %v1422_v18 = vpop.permute.xlu0 %1421  ;;  %2918 = vmatprep.subr.mxu0 %v2663_v8 }
 0x1b2   : > { %v1299_v19 = vrot.slane %v1283_v38, 1  ;;  %v1316_v42 = vsel %vm538_vm2, %v1300_v52, %v3682_v44  ;;  %2919 = vmatpush3.msra.mxu0 %v2663_v8 }
 0x1b3   : > { %v1332_v24 = vmax.f32 %v1284_v45, %v1316_v42 }
 0x1b4   : > { %v1301_v57 = vsel %vm538_vm2, %v1299_v19, %v1300_v52  ;;  %v1302_v56 = vsel %vm538_vm2, %v1298_v30, %v1299_v19  ;;  %v1360_v23 = vld [vmem:[#allocation2 + $0x50] ss:$2 sm:$0xff] }
 0x1b5   : > { %v1330_v61 = vmax.f32 %v1282_v29, %v1302_v56  ;;  %v1331_v53 = vmax.f32 %v1283_v38, %v1301_v57  ;;  %v1442_v36 = vrot.slane %v1360_v23, 1  ;;  %2863 = vmatmul.mubr.msk.f32.gmra.mxu1 %vm1333_vm4, %v1360_v23  ;;  %1349 = vst.msk [vmem:[#allocation2 + $0x78] sm:$0xff] %vm1333_vm4, %v1332_v24  ;;  %v1479_v4 = vpop.permute.xlu0 %1478  ;;  %v1387_v29 = vsel %vm409_vm3, %v1373_v39, %v1374_v40 }
 0x1b6   : > { %v1430_v25 = vmul.f32 %v1397_v50, %v1387_v29  ;;  %v1378_v17 = vrot.slane %v1360_v23, 7  ;;  %v3865_v50 = vld [vmem:[%s4032_s6 + $0x8] sm:$0xff] }
 0x1b7   : > { %1347 = vst.msk [vmem:[#allocation2 + $0x68] sm:$0xff] %vm1333_vm4, %v1330_v61  ;;  %1348 = vst.msk [vmem:[#allocation2 + $0x70] sm:$0xff] %vm1333_vm4, %v1331_v53  ;;  %v1447_v44 = vsel %vm538_vm2, %v1441_v32, %v1442_v36  ;;  %v1483_v32 = vpop.permute.xlu1 %1482  ;;  %v2652_v53 = vld [vmem:[%s4031_s5] ss:$0 sm:$0xff] }
 0x1b8   : > { %v1489_v5 = vmul.f32 %v1471_v51, %v1447_v44  ;;  %v1383_v10 = vsel %vm409_vm3, %v1377_v28, %v1378_v17 }
 0x1b9   : > { %v1434_v31 = vmul.f32 %v1417_v58, %v1383_v10 }
 0x1ba   : > { %2890 = vmatprep.mubr.msk.f32.mxu0 %vm1333_vm4, %v1489_v5 }
 0x1be   : > { %v1362_v20 = vld [vmem:[#allocation2 + $0x60] ss:$2 sm:$0xff]  ;;  %v1364_v26 = vld [vmem:[#allocation2 + $0x70] ss:$2 sm:$0xff] }
 0x1bf   : > { %v1443_v2 = vrot.slane %v1362_v20, 1  ;;  %v1380_v34 = vrot.slane %v1364_v26, 7  ;;  %2865 = vmatprep.mubr.msk.f32.mxu1 %vm1333_vm4, %v1362_v20  ;;  %v1444_v9 = vrot.slane %v1364_v26, 1 }
 0x1c0   : > { %2866 = vmatmul.mubr.msk.f32.gmra.mxu1 %vm1333_vm4, %v1364_v26 }
 0x1c1   : > { %v1446_v14 = vsel %vm538_vm2, %v1442_v36, %v1443_v2  ;;  %v1445_v3 = vsel %vm538_vm2, %v1443_v2, %v1444_v9  ;;  %v1452_v33 = vsel %vm538_vm2, %v1444_v9, %v1437_v35  ;;  %v1388_v30 = vsel %vm409_vm3, %v1380_v34, %v1373_v39 }
 0x1c2   : > { %v1490_v41 = vmul.f32 %v1475_v21, %v1446_v14  ;;  %v1491_v16 = vmul.f32 %v1479_v4, %v1445_v3  ;;  %v1429_v11 = vmul.f32 %v3710_v15, %v1388_v30  ;;  %v1492_v22 = vmul.f32 %v1483_v32, %v1452_v33 }
 0x1c3   : > { %v1379_v35 = vrot.slane %v1362_v20, 7  ;;  %v1432_v15 = vmul.f32 %v3771_v27, %v1385_v55 }
 0x1c4   : > { %2891 = vmatmul.mubr.msk.f32.gmra.mxu0 %vm1333_vm4, %v1490_v41  ;;  %2870 = vmatprep.mubr.msk.f32.mxu1 %vm1333_vm4, %v1429_v11 }
 0x1c5   : > { %2893 = vmatprep.mubr.msk.f32.mxu0 %vm1333_vm4, %v1491_v16  ;;  %2871 = vmatmul.mubr.msk.f32.vlgmr.msra.gmra.mxu1 %vm1333_vm4, %v1430_v25  ;;  %v1382_v37 = vsel %vm409_vm3, %v1378_v17, %v1379_v35  ;;  %v1381_v0 = vsel %vm409_vm3, %v1379_v35, %v1380_v34 }
 0x1c6   : > { %2873 = vmatprep.mubr.msk.f32.mxu1 %vm1333_vm4, %v1431_v13  ;;  %v1435_v60 = vmul.f32 %v1422_v18, %v1382_v37  ;;  %v1436_v27 = vmul.f32 %v1427_v6, %v1381_v0  ;;  %2897 = vmatpush3.msra.mxu1 %v2654_v54 }
 0x1c7   : > { %2898 = vmatprep.subr.mxu1 %v2653_v7 }
 0x1c8   : > { %2894 = vmatmul.mubr.msk.f32.gmra.mxu0 %vm1333_vm4, %v1492_v22  ;;  %2899 = vmatpush3.msra.mxu1 %v2653_v7 }
 0x1c9   : > { %2874 = vmatmul.mubr.msk.f32.gmra.mxu1 %vm1333_vm4, %v1432_v15  ;;  %2906 = vmatprep.subr.mxu1 %v3865_v50 }
 0x1ca   : > { %2876 = vmatprep.mubr.msk.f32.mxu1 %vm1333_vm4, %v1433_v62 }
 0x1cd   : > { %2877 = vmatmul.mubr.msk.f32.gmra.mxu1 %vm1333_vm4, %v1434_v31 }
 0x1ce   : > { %2879 = vmatprep.mubr.msk.f32.mxu1 %vm1333_vm4, %v1435_v60 }
 0x1d1   : > { %2880 = vmatmul.mubr.msk.f32.gmra.mxu1 %vm1333_vm4, %v1436_v27  ;;  %v3877_v27 = vpop.permute.xlu1 %1970 }
 0x245   : > { %v2858_v46 = vpop.f32.mrf.mxu1 }
 0x247   : > { %v1586_v47 = vpop.f32.mrf.mxu1 }
 0x254   : > { %v2886_v51 = vpop.f32.mrf.mxu0 }
 0x256   : > { %v1846_v42 = vpop.f32.mrf.mxu0 }
 0x25d   : > { %v2861_v45 = vpop.f32.mrf.mxu1 }
 0x25f   : > { %v1596_v38 = vpop.f32.mrf.mxu1 }
 0x26c   : > { %v2889_v57 = vpop.f32.mrf.mxu0 }
 0x26e   : > { %v1856_v61 = vpop.f32.mrf.mxu0 }
 0x275   : > { %v2864_v49 = vpop.f32.mrf.mxu1 }
 0x277   : > { %v1606_v52 = vpop.f32.mrf.mxu1 }
 0x280   : > { %v2867_v19 = vpop.f32.mrf.mxu1 }
 0x282   : > { %v1616_v24 = vpop.f32.mrf.mxu1 }
 0x284   : > { %v2892_v21 = vpop.f32.mrf.mxu0 }
 0x285   : > { %v2872_v56 = vpop.f32.mrf.mxu1 }
 0x286   : > { %v1721_v23 = vadd.f32 %v2872_v56, %v2858_v46  ;;  %v1866_v4 = vpop.f32.mrf.mxu0 }
 0x287   : > { %v1715_v36 = vpop.f32.mrf.mxu1 }
 0x288   : > { %v1886_v58 = vadd.f32 %v2886_v51, %v1721_v23  ;;  %v1716_v44 = vadd.f32 %v1715_v36, %v1586_v47  ;;  %v2895_v33 = vpop.f32.mrf.mxu0 }
 0x289   : > { %v2875_v5 = vpop.f32.mrf.mxu1 }
 0x28a   : > { %v1901_v18 = vadd.f32 %v2652_v53, %v1886_v58  ;;  %v1885_v6 = vadd.f32 %v1846_v42, %v1716_v44  ;;  %v1731_v40 = vadd.f32 %v2875_v5, %v2861_v45  ;;  %v1876_v31 = vpop.f32.mrf.mxu0 }
 0x28b   : > { %v1725_v20 = vpop.f32.mrf.mxu1 }
 0x28c   : > { %v1909_v26 = vmax.f32 %v1901_v18, 0.0  ;;  %v1900_v1 = vadd.f32 %v2652_v53, %v1885_v6  ;;  %v1888_v2 = vadd.f32 %v2889_v57, %v1731_v40  ;;  %v1726_v34 = vadd.f32 %v1725_v20, %v1596_v38  ;;  %v1976_v6 = vpop.permute.xlu0 %1975 }
 0x28d   : > { %v2878_v9 = vpop.f32.mrf.mxu1 }
 0x28e   : > { %v1908_v39 = vmax.f32 %v1900_v1, 0.0  ;;  %v1903_v14 = vadd.f32 %v2652_v53, %v1888_v2  ;;  %v1887_v3 = vadd.f32 %v1856_v61, %v1726_v34  ;;  %v1917_v29 = vrot.slane %v1909_v26, 1  ;;  %v2002_v61 = vpop.permute.xlu1 %2001  ;;  %v2020_v1 = vld [vmem:[%s4032_s6] sm:$0xff] }
 0x28f   : > { %v1741_v59 = vadd.f32 %v2878_v9, %v2864_v49  ;;  %v1735_v41 = vpop.f32.mrf.mxu1 }
 0x290   : > { %v1916_v16 = vrot.slane %v1908_v39, 1  ;;  %v1911_v43 = vmax.f32 %v1903_v14, 0.0  ;;  %v1902_v28 = vadd.f32 %v2652_v53, %v1887_v3  ;;  %v1736_v32 = vadd.f32 %v1735_v41, %v1606_v52 }
 0x291   : > { %v1890_v30 = vadd.f32 %v2892_v21, %v1741_v59  ;;  %v2881_v11 = vpop.f32.mrf.mxu1 }
 0x292   : > { %v1930_v25 = vsel %vm538_vm2, %v1916_v16, %v1917_v29  ;;  %v1910_v13 = vmax.f32 %v1902_v28, 0.0  ;;  %v1889_v55 = vadd.f32 %v1866_v4, %v1736_v32  ;;  %v1751_v63 = vadd.f32 %v2881_v11, %v2867_v19  ;;  %v2006_v20 = vpop.permute.xlu1 %2005  ;;  %v1981_v4 = vpop.permute.xlu0 %1980 }
 0x293   : > { %v1932_v17 = vmax.f32 %v1908_v39, %v1930_v25  ;;  %v1905_v22 = vadd.f32 %v2652_v53, %v1890_v30  ;;  %v1745_v35 = vpop.f32.mrf.mxu1  ;;  %v1919_v15 = vrot.slane %v1911_v43, 1 }
 0x294   : > { %v1918_v62 = vrot.slane %v1910_v13, 1  ;;  %v1904_v10 = vadd.f32 %v2652_v53, %v1889_v55  ;;  %v1746_v37 = vadd.f32 %v1745_v35, %v1616_v24  ;;  %v1892_v0 = vadd.f32 %v2895_v33, %v1751_v63 }
 0x295   : > { %1941 = vst.msk [vmem:[#allocation3] sm:$0xff] %vm1940_vm5, %v1932_v17  ;;  %v1913_v60 = vmax.f32 %v1905_v22, 0.0 }
 0x296   : > { %v1928_v54 = vsel %vm538_vm2, %v1918_v62, %v1919_v15  ;;  %v1929_v7 = vsel %vm538_vm2, %v1917_v29, %v1918_v62  ;;  %v1912_v48 = vmax.f32 %v1904_v10, 0.0  ;;  %v1891_v8 = vadd.f32 %v1876_v31, %v1746_v37  ;;  %v1986_v14 = vpop.permute.xlu1 %1985  ;;  %v2010_v25 = vpop.permute.xlu0 %2009 }
 0x297   : > { %v1933_v46 = vmax.f32 %v1909_v26, %v1929_v7  ;;  %v1934_v47 = vmax.f32 %v1910_v13, %v1928_v54  ;;  %v1907_v45 = vadd.f32 %v2652_v53, %v1892_v0  ;;  %v1921_v38 = vrot.slane %v1913_v60, 1  ;;  %v2369_v54 = vld [vmem:[%s4034_s8 + $0x8] sm:$0xff]  ;;  %v2368_v7 = vld [vmem:[%s4034_s8] sm:$0xff] }
 0x298   : > { %v1920_v49 = vrot.slane %v1912_v48, 1  ;;  %v1906_v52 = vadd.f32 %v2652_v53, %v1891_v8  ;;  %v3096_v0 = vmov 0.0  }
 0x299   : > { %1942 = vst.msk [vmem:[#allocation3 + $0x8] sm:$0xff] %vm1940_vm5, %v1933_v46  ;;  %1943 = vst.msk [vmem:[#allocation3 + $0x10] sm:$0xff] %vm1940_vm5, %v1934_v47  ;;  %v1915_v51 = vmax.f32 %v1907_v45, 0.0 }
 0x29a   : > { %v1926_v19 = vsel %vm538_vm2, %v1920_v49, %v1921_v38  ;;  %v1927_v42 = vsel %vm538_vm2, %v1919_v15, %v1920_v49  ;;  %v1914_v24 = vmax.f32 %v1906_v52, 0.0  ;;  %v2014_v63 = vpop.permute.xlu1 %2013 }
 0x29b   : > { %v1935_v57 = vmax.f32 %v1911_v43, %v1927_v42  ;;  %v1936_v56 = vmax.f32 %v1912_v48, %v1926_v19  ;;  %v1923_v23 = vrot.slane %v1915_v51, 1 }
 0x29c   : > { %v1922_v36 = vrot.slane %v1914_v24, 1 }
 0x29d   : > { %1944 = vst.msk [vmem:[#allocation3 + $0x18] sm:$0xff] %vm1940_vm5, %v1935_v57  ;;  %1945 = vst.msk [vmem:[#allocation3 + $0x20] sm:$0xff] %vm1940_vm5, %v1936_v56  ;;  %v1931_v53 = vsel %vm538_vm2, %v1923_v23, %v1916_v16 }
 0x29e   : > { %v1939_v58 = vmax.f32 %v1915_v51, %v1931_v53  ;;  %v1924_v44 = vsel %vm538_vm2, %v1922_v36, %v1923_v23  ;;  %v1925_v21 = vsel %vm538_vm2, %v1921_v38, %v1922_v36  ;;  %v2669_v51 = vld [vmem:[%s4033_s7] ss:$0 sm:$0xff] }
 0x29f   : > { %v1937_v5 = vmax.f32 %v1913_v60, %v1925_v21  ;;  %v1938_v18 = vmax.f32 %v1914_v24, %v1924_v44  ;;  %v2371_v60 = vld [vmem:[%s4034_s8 + $0x18] sm:$0xff] }
 0x2a0   : > { %1948 = vst.msk [vmem:[#allocation3 + $0x38] sm:$0xff] %vm1940_vm5, %v1939_v58  ;;  %v1949_v40 = vld [vmem:[#allocation3] ss:$2 sm:$0xff] }
 0x2a1   : > { %1946 = vst.msk [vmem:[#allocation3 + $0x28] sm:$0xff] %vm1940_vm5, %v1937_v5  ;;  %1947 = vst.msk [vmem:[#allocation3 + $0x30] sm:$0xff] %vm1940_vm5, %v1938_v18  ;;  %2900 = vmatprep.mubr.msk.f32.mxu1 %vm1940_vm5, %v1949_v40  ;;  %v1992_v2 = vrot.slane %v1949_v40, 1  ;;  %v1960_v29 = vrot.slane %v1949_v40, 7 }
 0x2a4   : > { %v1951_v26 = vld [vmem:[#allocation3 + $0x10] ss:$2 sm:$0xff] }
 0x2a5   : > { %v1993_v34 = vrot.slane %v1951_v26, 1  ;;  %2901 = vmatmul.mubr.msk.f32.vlgmr.msra.gmra.mxu1 %vm1940_vm5, %v1951_v26  ;;  %v1961_v9 = vrot.slane %v1951_v26, 7 }
 0x2a6   : > { %2907 = vmatpush3.msra.mxu1 %v3865_v50 }
 0x2a7   : > { %v1998_v39 = vsel %vm538_vm2, %v1992_v2, %v1993_v34  ;;  %2908 = vmatprep.subr.mxu1 %v2020_v1  ;;  %v1966_v33 = vsel %vm409_vm3, %v1960_v29, %v1961_v9 }
 0x2a8   : > { %v1955_v3 = vld [vmem:[#allocation3 + $0x30] ss:$2 sm:$0xff]  ;;  %v2016_v59 = vmul.f32 %v2002_v61, %v1998_v39  ;;  %v1953_v41 = vld [vmem:[#allocation3 + $0x20] ss:$2 sm:$0xff]  ;;  %2909 = vmatpush3.msra.mxu1 %v2020_v1  ;;  %v1989_v17 = vmul.f32 %v1976_v6, %v1966_v33 }
 0x2a9   : > { %v1963_v16 = vrot.slane %v1955_v3, 7  ;;  %v1994_v43 = vrot.slane %v1953_v41, 1  ;;  %v1962_v28 = vrot.slane %v1953_v41, 7  ;;  %2903 = vmatprep.mubr.msk.f32.mxu1 %vm1940_vm5, %v1953_v41  ;;  %v1995_v32 = vrot.slane %v1955_v3, 1  ;;  %2926 = vmatprep.subr.mxu1 %v3096_v0 }
 0x2aa   : > { %2904 = vmatmul.mubr.msk.f32.gmra.mxu1 %vm1940_vm5, %v1955_v3  ;;  %2920 = vmatprep.mubr.msk.f32.mxu0 %vm1940_vm5, %v2016_v59 }
 0x2ab   : > { %v1967_v50 = vsel %vm409_vm3, %v1963_v16, %v1960_v29  ;;  %v1997_v30 = vsel %vm538_vm2, %v1993_v34, %v1994_v43  ;;  %v1965_v11 = vsel %vm409_vm3, %v1961_v9, %v1962_v28  ;;  %v1996_v22 = vsel %vm538_vm2, %v1994_v43, %v1995_v32 }
 0x2ac   : > { %v1988_v13 = vmul.f32 %v3877_v27, %v1967_v50  ;;  %v2017_v55 = vmul.f32 %v2006_v20, %v1997_v30  ;;  %v1999_v35 = vsel %vm538_vm2, %v1995_v32, %v1992_v2  ;;  %v1990_v15 = vmul.f32 %v1981_v4, %v1965_v11  ;;  %v2370_v27 = vld [vmem:[%s4034_s8 + $0x10] sm:$0xff] }
 0x2ad   : > { %v1964_v62 = vsel %vm409_vm3, %v1962_v28, %v1963_v16  ;;  %v2018_v10 = vmul.f32 %v2010_v25, %v1996_v22  ;;  %v2019_v37 = vmul.f32 %v2014_v63, %v1999_v35  ;;  %v2670_v63 = vld [vmem:[%s4035_s9] ss:$0 sm:$0xff] }
 0x2ae   : > { %2910 = vmatprep.mubr.msk.f32.mxu1 %vm1940_vm5, %v1988_v13  ;;  %2921 = vmatmul.mubr.msk.f32.vlgmr.msra.gmra.mxu0 %vm1940_vm5, %v2017_v55  ;;  %v1991_v31 = vmul.f32 %v1986_v14, %v1964_v62 }
 0x2af   : > { %2911 = vmatmul.mubr.msk.f32.vlgmr.msra.gmra.mxu1 %vm1940_vm5, %v1989_v17  ;;  %2923 = vmatprep.mubr.msk.f32.mxu0 %vm1940_vm5, %v2018_v10 }
 0x2b0   : > { %2913 = vmatprep.mubr.msk.f32.mxu1 %vm1940_vm5, %v1990_v15  ;;  %2927 = vmatpush3.msra.mxu1 %v2371_v60 }
 0x2b1   : > { %2928 = vmatprep.subr.mxu1 %v3096_v0 }
 0x2b2   : > { %2924 = vmatmul.mubr.msk.f32.gmra.mxu0 %vm1940_vm5, %v2019_v37  ;;  %2929 = vmatpush3.msra.mxu1 %v2370_v27 }
 0x2b3   : > { %2914 = vmatmul.mubr.msk.f32.gmra.mxu1 %vm1940_vm5, %v1991_v31  ;;  %2930 = vmatprep.subr.mxu1 %v3096_v0 }
 0x2b4   : > { %2934 = vmatprep.mubr.msk.f32.mxu1 %vm3097_vm6, %v3096_v0  ;;  %2931 = vmatpush3.msra.mxu1 %v2369_v54 }
 0x2b5   : > { %2932 = vmatprep.subr.mxu1 %v3096_v0 }
 0x2b6   : > { %2933 = vmatpush3.msra.mxu1 %v2368_v7 }
 0x365   : > { %v2902_v48 = vpop.f32.mrf.mxu1 }
 0x367   : > { %v2103_v8 = vpop.f32.mrf.mxu1 }
 0x36a   : > { %v2905_v46 = vpop.f32.mrf.mxu1 }
 0x36c   : > { %v2113_v47 = vpop.f32.mrf.mxu1 }
 0x36e   : > { %v2922_v45 = vpop.f32.mrf.mxu0 }
 0x36f   : > { %v2912_v38 = vpop.f32.mrf.mxu1 }
 0x370   : > { %v2206_v49 = vadd.f32 %v2912_v38, %v2902_v48  ;;  %v2300_v52 = vpop.f32.mrf.mxu0 }
 0x371   : > { %v2200_v19 = vpop.f32.mrf.mxu1 }
 0x372   : > { %v2320_v42 = vadd.f32 %v2922_v45, %v2206_v49  ;;  %v2201_v24 = vadd.f32 %v2200_v19, %v2103_v8  ;;  %v2925_v57 = vpop.f32.mrf.mxu0 }
 0x373   : > { %v2915_v56 = vpop.f32.mrf.mxu1 }
 0x374   : > { %v2331_v23 = vadd.f32 %v2669_v51, %v2320_v42  ;;  %v2319_v61 = vadd.f32 %v2300_v52, %v2201_v24  ;;  %v2216_v36 = vadd.f32 %v2915_v56, %v2905_v46  ;;  %v2310_v18 = vpop.f32.mrf.mxu0 }
 0x375   : > { %v2210_v53 = vpop.f32.mrf.mxu1 }
 0x376   : > { %v2335_v58 = vmax.f32 %v2331_v23, 0.0  ;;  %v2330_v44 = vadd.f32 %v2669_v51, %v2319_v61  ;;  %v2322_v21 = vadd.f32 %v2925_v57, %v2216_v36  ;;  %v2211_v5 = vadd.f32 %v2210_v53, %v2113_v47 }
 0x378   : > { %v2334_v6 = vmax.f32 %v2330_v44, 0.0  ;;  %v2333_v40 = vadd.f32 %v2669_v51, %v2322_v21  ;;  %v2321_v20 = vadd.f32 %v2310_v18, %v2211_v5  ;;  %v2339_v26 = vrot.slane %v2335_v58, 1 }
 0x37a   : > { %v2338_v1 = vrot.slane %v2334_v6, 1  ;;  %v2337_v2 = vmax.f32 %v2333_v40, 0.0  ;;  %v2332_v34 = vadd.f32 %v2669_v51, %v2321_v20 }
 0x37c   : > { %v2344_v4 = vsel %vm538_vm2, %v2338_v1, %v2339_v26  ;;  %v2341_v9 = vrot.slane %v2337_v2, 1  ;;  %v2336_v39 = vmax.f32 %v2332_v34, 0.0 }
 0x37d   : > { %v2346_v14 = vmax.f32 %v2334_v6, %v2344_v4 }
 0x37e   : > { %v2345_v3 = vsel %vm538_vm2, %v2341_v9, %v2338_v1  ;;  %v2340_v29 = vrot.slane %v2336_v39, 1 }
 0x37f   : > { %2351 = vst.msk [vmem:[#allocation4] sm:$0xff] %vm2350_vm7, %v2346_v14  ;;  %v2349_v59 = vmax.f32 %v2337_v2, %v2345_v3 }
 0x380   : > { %v2342_v41 = vsel %vm538_vm2, %v2340_v29, %v2341_v9  ;;  %v2343_v16 = vsel %vm538_vm2, %v2339_v26, %v2340_v29 }
 0x381   : > { %2354 = vst.msk [vmem:[#allocation4 + $0x18] sm:$0xff] %vm2350_vm7, %v2349_v59  ;;  %v2347_v43 = vmax.f32 %v2335_v58, %v2343_v16  ;;  %v2348_v28 = vmax.f32 %v2336_v39, %v2342_v41 }
 0x383   : > { %2352 = vst.msk [vmem:[#allocation4 + $0x8] sm:$0xff] %vm2350_vm7, %v2347_v43  ;;  %2353 = vst.msk [vmem:[#allocation4 + $0x10] sm:$0xff] %vm2350_vm7, %v2348_v28 }
 0x38a   : > { %v2355_v32 = vld [vmem:[#allocation4] ss:$2 sm:$0xff]  ;;  %v2357_v33 = vld [vmem:[#allocation4 + $0x10] ss:$2 sm:$0xff] }
 0x38b   : > { %v2358_v50 = vrot.slane %v2355_v32, 1  ;;  %v2359_v30 = vrot.slane %v2357_v33, 1 }
 0x38d   : > { %v2360_v11 = vsel %vm538_vm2, %v2358_v50, %v2359_v30  ;;  %v2361_v25 = vsel %vm538_vm2, %v2359_v30, %v2358_v50 }
 0x38e   : > { %v2362_v13 = vadd.f32 %v2360_v11, %v2355_v32  ;;  %v2363_v55 = vadd.f32 %v2361_v25, %v2357_v33 }
 0x390   : > { %2364 = vst.msk [vmem:[#allocation5] sm:$0xff] %vm2350_vm7, %v2362_v13  ;;  %2365 = vst.msk [vmem:[#allocation5 + $0x8] sm:$0xff] %vm2350_vm7, %v2363_v55 }
 0x397   : > { %v2366_v17 = vld [vmem:[#allocation5] ss:$2 sm:$0xff] }
 0x398   : > { %v2367_v22 = vmul.f32 0.5, %v2366_v17 }
 0x39a   : > { %2935 = vmatmul.mubr.msk.f32.vlgmr.msra.gmra.mxu1 %vm2350_vm7, %v2367_v22 }
 0x45a   : > { %v2448_v35 = vpop.f32.mrf.mxu1 }
 0x45b   : > { %v2449_v15 = vadd.f32 %v2670_v63, %v2448_v35 }
 0x45c   : > { %v2936_v12 = vpop.f32.mrf.mxu1 }
 0x45d   : > { %v2452_v62 = vmax.f32 %v2449_v15, 0.0 }
 0x45f   : > { %v2453_v10 = vmul.f32 %v2452_v62, %v2452_v62 }
 0x461   : > { %v2454_v37 = vsel %vm1940_vm5, %v2453_v10, 0.0 }
 0x462   : > { %2455 = vadd.xlane.f32.xlu1 %v2454_v37 }
 0x4eb   : > { %v2456_v31 = vpop.xlane.xlu1 %2455 }
 0x4ec   : > { %v2457_v60 = vmax.f32 %v2456_v31, 1e-24 }
 0x4ee   : > { %3026 = vrsqrt.f32 %v2457_v60 }
 0x4fb   : > { %v3027_v0 = vpop.eup %3026 }
 0x4fc   : > { %v2459_v27 = vmul.f32 %v3027_v0, %v2452_v62 }
 0x4fe   : > { %2463 = vrot.lane.b32.xlu0 %v2459_v27, %s3098_s18  ;;  %2461 = vst.msk [vmem:[%s3974_s17] sm:$0x1] %vm2460_vm8, %v2459_v27 }
 0x502   : > { %2468 = vrot.lane.b32.xlu0 %v2459_v27, %s3099_s25  ;;  %s3988_s25 = scalar_lea.hbm %s4036_s10, %s3218_s29 }
 0x506   : > { %2473 = vrot.lane.b32.xlu0 %v2459_v27, %s3100_s26  ;;  %s2499_s26 = scalar_lea.sflag [#allocation7], %s351_s21 }
 0x50a   : > { %2478 = vrot.lane.b32.xlu0 %v2459_v27, %s3101_s27  ;;  %s3028_s27 = scalar_lea.vmem %s2512_s12, 16 }
 0x50b   : > { %p3029_p11 = scmp.ne.s32.totalorder %s2512_s12, %s3028_s27 }
 0x50d   : > { %p3030_p12 = pnand %p3029_p11, %p3196_p5 }
 0x50e   : > { %2483 = vrot.lane.b32.xlu0 %v2459_v27, %s3102_s28  ;;  %s3105_s28 = smov [#allocation6]  }
 0x50f   : > { %p3031_p13 = pneg %p3030_p12 }
 0x512   : > { %2488 = vrot.lane.b32.xlu0 %v2459_v27, %s3103_s30  ;;  %s3032_s30 = sshll.u32 %s3105_s28, 4  ;;  %s3033_s30 = int_to_ptr.vmem [resolvable:$false] %s3032_s30 }
 0x513   : > { %p3035_p0 = scmp.lt.s32.totalorder %s2512_s12, %s3033_s30 }
 0x516   : > { %2493 = vrot.lane.b32.xlu0 %v2459_v27, %s3104_s11  ;;  %s3034_s11 = scalar_lea.vmem %s3033_s30, 32 }
 0x517   : > { %p3036_p1 = scmp.lt.s32.totalorder %s3034_s11, %s3028_s27 }
 0x519   : > { %p3037_p2 = por %p3036_p1, %p3035_p0 }
 0x51b   : > { %p3038_p3 = pnand %p3037_p2, %p3031_p13 }
 0x570   : > { %v2464_v54 = vpop.permute.xlu0 %2463 }
 0x571   : > { %2467 = vst.msk [vmem:[%s3974_s17 - $0x1] sm:$0x2] %vm2466_vm9, %v2464_v54 }
 0x574   : > { %v2469_v7 = vpop.permute.xlu0 %2468 }
 0x575   : > { %2472 = vst.msk [vmem:[%s3974_s17 - $0x2] sm:$0x4] %vm2471_vm10, %v2469_v7 }
 0x578   : > { %v2474_v48 = vpop.permute.xlu0 %2473 }
 0x579   : > { %2477 = vst.msk [vmem:[%s3974_s17 - $0x3] sm:$0x8] %vm2476_vm11, %v2474_v48 }
 0x57c   : > { %v2479_v8 = vpop.permute.xlu0 %2478 }
 0x57d   : > { %2482 = vst.msk [vmem:[%s3974_s17 - $0x4] sm:$0x10] %vm2481_vm12, %v2479_v8 }
 0x580   : > { %v2484_v46 = vpop.permute.xlu0 %2483 }
 0x581   : > { %2487 = vst.msk [vmem:[%s3974_s17 - $0x5] sm:$0x20] %vm2486_vm13, %v2484_v46 }
 0x584   : > { %v2489_v47 = vpop.permute.xlu0 %2488 }
 0x585   : > { %2492 = vst.msk [vmem:[%s3974_s17 - $0x6] sm:$0x40] %vm2491_vm14, %v2489_v47 }
 0x588   : > { %v2494_v45 = vpop.permute.xlu0 %2493 }
 0x589   : > { %2497 = vst.msk [vmem:[%s3974_s17 - $0x7] sm:$0x80] %vm2496_vm15, %v2494_v45 }
 0x58a   : > { %3041 = shalt.err (!%p3038_p3)
}
 0x58b   : > { %s3042_s29 = scalar_lea.hbm %s3988_s25, 16  ;;  %s3046_s20 = scalar_lea.hbm %s4036_s10, 32 }
 0x58c   : > { %p3043_p4 = scmp.ne.s32.totalorder %s3988_s25, %s3042_s29  ;;  %p3047_p9 = scmp.lt.s32.totalorder %s3988_s25, %s4036_s10 }
 0x58d   : > { %p3048_p10 = scmp.lt.s32.totalorder %s3046_s20, %s3042_s29 }
 0x58e   : > { %p3044_p7 = pnand %p3043_p4, %p3196_p5 }
 0x58f   : > { %p3049_p11 = por %p3048_p10, %p3047_p9 }
 0x590   : > { %p3045_p8 = pneg %p3044_p7 }
 0x592   : > { %p3050_p12 = pnand %p3049_p11, %p3045_p8 }
 0x594   : > { %3053 = shalt.err (!%p3050_p12)
}
 0x595   : > { %2937 = dma.vmem_to_hbm [thread:$0]  (%p3196_p5), %s2512_s12, 16, %s3988_s25, %s2499_s26  }
 0x596 PF: > { %p2943_p13 = scmp.ge.s32.totalorder %s3088_s16, 2  ;;  %s2523_s27 = sand.u32 1, %s3076_s13  }
 0x597   : > { %s2524_s30 = scalar_lea.sflag [#allocation7], %s2523_s27 }
 0x598   : > { %p2940_p0 = pnand %p2943_p13, %p3200_p6 }
 0x59a   : > { %p2941_p1 = pneg %p2940_p0 }
 0x59c   : > { %3071 = dma.done.wait (%p2941_p1), %s2524_s30, 16  }
 0x59d   : > { %3073 = vsyncadd (%p2941_p1), %s2524_s30, 4294967280  ;;  %p20_p2 = scmp.ge.s32.totalorder %s3184_s19, 4   ;;  %s4039_s13 = smov %s3080_s14 }
 0x59e   : > { %s4040_s14 = smov %s3084_s15  ;;  %s4041_s15 = smov %s3194_s22 }
 0x59f   : > { %s4042_s16 = smov %s3184_s19  ;;  %22 = sbr.rel (!%p20_p2) target bundleno = 3 (0x3), region = 112 }
 0x5a4   :  { %2528 = vsyncpa [#allocation7], 1 }
 0x5a5   :  { %2530 = vsyncpa [#allocation7 + $0x1], 1 }

</bundles_post_ra>
